<compile_context>
chip_gen: v7x
topology: tpu7x:2x2x1
jax: 0.10.0
libtpu: 0.0.40
codegen_flags: <defaults>
</compile_context>

<pallas_src>
import jax
import jax.numpy as jnp
from jax.experimental import pallas as pl
from jax.experimental.pallas import tpu as pltpu


# --------------------------------------------------------------------------- #
# Kernel
# --------------------------------------------------------------------------- #
def _attention_kernel(enc_ref, dec_ref, w1_ref, b1_ref, w2_ref, w3_ref, b3_ref,
                      w4_ref, b42_ref, wv_ref, bv_ref, ctx_ref, score_ref):
    # enc_ref : (TB, L, C) f32       dec_ref : (TB, 1, H) f32
    # w1: (C, H) bf16   b1: (1, H)   w2/w3/w4: (H, H)   b3/b42: (1, H)
    # wv: (1, H)        bv: (1,) scalar in SMEM
    TB, L, C = enc_ref.shape
    H = w1_ref.shape[1]

    x = enc_ref[...]                                      # (TB, L, C) f32
    x2 = x.reshape(TB * L, C)                             # fold batch rows -> big M

    # enc_wts: Linear(C, H) -> ReLU -> Linear(H, H).  bf16 operands on the MXU
    # for the K=2048 matmul; f32 accumulate via preferred_element_type.
    h1 = jnp.maximum(
        jnp.dot(x2.astype(jnp.bfloat16), w1_ref[...],
                preferred_element_type=jnp.float32) + b1_ref[...],
        0.0)                                              # (TB*L, H)
    h2 = jnp.dot(h1, w2_ref[...], preferred_element_type=jnp.float32)  # (TB*L, H)

    # dec_wts MLP folded in-kernel (M = TB rows, <1% of the enc matmul work);
    # enc_wts[2].bias (b2) is pre-folded into b42 so no bias is missing.
    d = dec_ref[...].reshape(TB, H)
    d1 = jnp.maximum(
        jnp.dot(d, w3_ref[...], preferred_element_type=jnp.float32) + b3_ref[...],
        0.0)                                              # (TB, H)
    d2 = jnp.dot(d1, w4_ref[...], preferred_element_type=jnp.float32) + b42_ref[...]

    s = jnp.tanh(h2.reshape(TB, L, H) + d2.reshape(TB, 1, H))   # (TB, L, H)

    # score_wts (Linear(H, 1)) as a lane-axis reduce (no N=1 MXU matmul, no
    # lane-padded (H, 1) weight tile).  bv is a scalar read from SMEM.
    logits = jnp.sum(s * wv_ref[...], axis=-1, keepdims=True) + bv_ref[0]  # (TB, L, 1)

    # softmax over the sequence axis (PyTorch dim=1)
    m = jnp.max(logits, axis=1, keepdims=True)
    e = jnp.exp(logits - m)
    p = e / jnp.sum(e, axis=1, keepdims=True)             # (TB, L, 1)
    score_ref[...] = p

    # bmm(enc (C, L), score (L, 1)) == sum_l x[:, l, :] * p[:, l].  Statically
    # unrolled over L so no enc-tile-sized (TB, L, C) product temporary is
    # materialized (keeps VMEM/vreg pressure down, lets TB grow).
    acc = x[:, 0:1, :] * p[:, 0:1, :]
    for l in range(1, L):
        acc = acc + x[:, l:l + 1, :] * p[:, l:l + 1, :]
    ctx_ref[...] = acc                                    # (TB, 1, C), lane-dense C


# --------------------------------------------------------------------------- #
# Tiling helpers
# --------------------------------------------------------------------------- #
def _row_budget(C):
    """Max fused-matmul rows (TB*L) from a hardware-aware VMEM budget.

    Budget ~= 2x f32 enc block (double buffer) + ~1x f32-equivalent temporaries
    (bf16 copy, small activations), kept under min(physical/8, 12 MiB) so it
    also fits v5e's 16 MiB default scoped-VMEM limit and v7x's 64 MiB VMEM.
    """
    try:
        vmem = pltpu.get_tpu_info().vmem_capacity_bytes
    except Exception:
        vmem = 64 << 20  # conservative fallback (v7x-sized)
    budget = min(vmem // 8, 12 << 20)
    bytes_per_row = int(C * 4 * 3.5)
    return max(8, budget // bytes_per_row)


def _pick_batch_tile(B, L, C):
    """Largest divisor of B within the VMEM row budget, preferring an even
    number of >= 2 grid steps so v7x can shard the parallel axis over 2 TCs."""
    row_cap = _row_budget(C)
    divs = [d for d in range(1, B + 1) if B % d == 0 and d * L <= row_cap]
    if not divs:
        return 1
    even_steps = [d for d in divs if (B // d) >= 2 and (B // d) % 2 == 0]
    pool = even_steps if even_steps else divs
    # TODO(synk): for awkward (e.g. prime) large B, pad the batch to a multiple
    # of the desired TB instead of degrading toward TB=1.
    return max(pool)


# --------------------------------------------------------------------------- #
# Wrapper
# --------------------------------------------------------------------------- #
def prepare_params(params):
    """One-time parameter prep (outside the jitted forward: no per-step dispatches).

    Casts w1 to bf16 (halves the dominant weight DMA), folds enc_wts[2].bias
    into the dec-path bias, and reshapes the scoring weight/bias for the
    lane-reduce / SMEM paths.
    """
    (w1, b1, w2, b2, w3, b3, w4, b4, wv, bv) = params
    return (w1.astype(jnp.bfloat16),      # (C, H) bf16
            b1,                           # (1, H)
            w2,                           # (H, H)
            w3,                           # (H, H)
            b3,                           # (1, H)
            w4,                           # (H, H)
            b4 + b2,                      # (1, H)  b2 folded into dec path
            wv.reshape(1, -1),            # (H, 1) -> (1, H)
            bv.reshape(1))                # scalar -> SMEM


@jax.jit
def attention_forward(enc_output, dec_hidden, prepped):
    """enc_output: (B, 2048, L) f32, dec_hidden: (B, H) f32
    -> (ctx (B, 2048), score (B, L, 1))."""
    (w1b, b1, w2, w3, b3, w4, b42, wv_row, bv_s) = prepped
    B, C, L = enc_output.shape
    H = dec_hidden.shape[1]

    # TODO(synk): drop this transpose if the producer can emit (B, L, C)
    # directly; it is the one remaining non-Pallas dispatch (BlockSpec cannot
    # permute dims, so it stays a wrapper-side XLA copy of the enc input).
    x = jnp.transpose(enc_output, (0, 2, 1))              # (B, L, C), C lane-dense
    dec3 = dec_hidden.reshape(B, 1, H)                    # metadata-only reshape

    TB = _pick_batch_tile(B, L, C)
    grid = (B // TB,)

    def rep(shape):
        return pl.BlockSpec(shape, lambda i: (0,) * len(shape))

    ctx3, score = pl.pallas_call(
        _attention_kernel,
        out_shape=(
            jax.ShapeDtypeStruct((B, 1, C), jnp.float32),
            jax.ShapeDtypeStruct((B, L, 1), jnp.float32),
        ),
        grid_spec=pltpu.PrefetchScalarGridSpec(
            num_scalar_prefetch=0,
            grid=grid,
            in_specs=[
                pl.BlockSpec((TB, L, C), lambda i: (i, 0, 0)),      # enc rows
                pl.BlockSpec((TB, 1, H), lambda i: (i, 0, 0)),      # dec_hidden rows
                rep((C, H)),                                        # w1 (bf16)
                rep((1, H)),                                        # b1
                rep((H, H)),                                        # w2
                rep((H, H)),                                        # w3
                rep((1, H)),                                        # b3
                rep((H, H)),                                        # w4
                rep((1, H)),                                        # b4 + b2
                rep((1, H)),                                        # wv (row)
                pl.BlockSpec(memory_space=pltpu.MemorySpace.SMEM),  # bv scalar
            ],
            out_specs=[
                pl.BlockSpec((TB, 1, C), lambda i: (i, 0, 0)),      # context
                pl.BlockSpec((TB, L, 1), lambda i: (i, 0, 0)),      # softmax scores
            ],
        ),
        compiler_params=pltpu.CompilerParams(
            dimension_semantics=("parallel",)),
    )(x, dec3, w1b, b1, w2, w3, b3, w4, b42, wv_row, bv_s)

    return ctx3[:, 0, :], score                           # (B, C), (B, L, 1)


# --------------------------------------------------------------------------- #
# Pure-JAX reference and parameter init
# --------------------------------------------------------------------------- #
def attention_reference(enc_output, dec_hidden, params):
    """Pure-JAX reference mirroring the PyTorch forward."""
    (w1, b1, w2, b2, w3, b3, w4, b4, wv, bv) = params
    x = jnp.transpose(enc_output, (0, 2, 1))                    # (B, L, C)
    h = jax.nn.relu(x @ w1 + b1) @ w2 + b2                      # (B, L, H)
    d = jax.nn.relu(dec_hidden @ w3 + b3) @ w4 + b4             # (B, H)
    s = jnp.tanh(h + d[:, None, :])
    logits = s @ wv + bv                                        # (B, L, 1)
    score = jax.nn.softmax(logits, axis=1)
    ctx = jnp.einsum("bcl,blo->bc", enc_output, score)          # (B, C)
    return ctx, score


def init_params(key, hidden_size, in_features=2048):
    """Deterministic synthetic parameters (shapes match the nn.Module)."""
    ks = jax.random.split(key, 10)

    def lin(kw, kb, fan_in, fan_out):
        lim = 1.0 / jnp.sqrt(fan_in)
        w = jax.random.uniform(kw, (fan_in, fan_out), jnp.float32, -lim, lim)
        b = jax.random.uniform(kb, (1, fan_out), jnp.float32, -lim, lim)
        return w, b

    w1, b1 = lin(ks[0], ks[1], in_features, hidden_size)   # enc_wts[0]
    w2, b2 = lin(ks[2], ks[3], hidden_size, hidden_size)   # enc_wts[2]
    w3, b3 = lin(ks[4], ks[5], hidden_size, hidden_size)   # dec_wts[0]
    w4, b4 = lin(ks[6], ks[7], hidden_size, hidden_size)   # dec_wts[2]
    wv, bv = lin(ks[8], ks[9], hidden_size, 1)             # score_wts
    return (w1, b1, w2, b2, w3, b3, w4, b4, wv, bv)


if __name__ == "__main__":
    B, C, L, H = 2, 2048, 8, 32   # C=2048 is fixed by Linear(2048, hidden)

    key = jax.random.PRNGKey(0)
    k_enc, k_dec, k_par = jax.random.split(key, 3)
    enc_output = jax.random.normal(k_enc, (B, C, L), jnp.float32)
    dec_hidden = jax.random.normal(k_dec, (B, H), jnp.float32)
    params = init_params(k_par, H, C)
    prepped = prepare_params(params)      # one-time prep, outside the hot path

    ctx, score = jax.block_until_ready(
        attention_forward(enc_output, dec_hidden, prepped))

    ctx_ref, score_ref = attention_reference(enc_output, dec_hidden, params)
    assert ctx.shape == (B, C) and score.shape == (B, L, 1)
    # Tolerances cover bf16-operand MXU matmuls (K=2048 path) vs. the
    # reference's default-precision f32 matmuls, per the perf review.
    assert jnp.allclose(ctx, ctx_ref, atol=2e-3, rtol=2e-3)
    assert jnp.allclose(score, score_ref, atol=5e-4, rtol=5e-4)

    print("KERNEL_OK")
</pallas_src>

<mosaic_0001>
module attributes {stable_mosaic.version = 11 : i64} {
  func.func @_attention_kernel(%arg0: i32, %arg1: memref<1x8x2048xf32, #tpu.memory_space<vmem>>, %arg2: memref<1x1x32xf32, #tpu.memory_space<vmem>>, %arg3: memref<2048x32xbf16, #tpu.memory_space<vmem>>, %arg4: memref<1x32xf32, #tpu.memory_space<vmem>>, %arg5: memref<32x32xf32, #tpu.memory_space<vmem>>, %arg6: memref<32x32xf32, #tpu.memory_space<vmem>>, %arg7: memref<1x32xf32, #tpu.memory_space<vmem>>, %arg8: memref<32x32xf32, #tpu.memory_space<vmem>>, %arg9: memref<1x32xf32, #tpu.memory_space<vmem>>, %arg10: memref<1x32xf32, #tpu.memory_space<vmem>>, %arg11: memref<1xf32, #tpu.memory_space<smem>>, %arg12: memref<1x1x2048xf32, #tpu.memory_space<vmem>>, %arg13: memref<1x8x1xf32, #tpu.memory_space<vmem>>) attributes {dimension_semantics = [#tpu.dimension_semantics<parallel>], iteration_bounds = array<i64: 2>, scalar_prefetch = 0 : i64, scratch_operands = 0 : i64, tpu.core_type = #tpu.core_type<tc>, window_params = [{transform_indices = @transform_0, window_bounds = array<i64: 1, 8, 2048>}, {transform_indices = @transform_1, window_bounds = array<i64: 1, 1, 32>}, {pipeline_mode = #tpu.pipeline_mode<synchronous>, transform_indices = @transform_2, window_bounds = array<i64: 2048, 32>}, {pipeline_mode = #tpu.pipeline_mode<synchronous>, transform_indices = @transform_3, window_bounds = array<i64: 1, 32>}, {pipeline_mode = #tpu.pipeline_mode<synchronous>, transform_indices = @transform_4, window_bounds = array<i64: 32, 32>}, {pipeline_mode = #tpu.pipeline_mode<synchronous>, transform_indices = @transform_5, window_bounds = array<i64: 32, 32>}, {pipeline_mode = #tpu.pipeline_mode<synchronous>, transform_indices = @transform_6, window_bounds = array<i64: 1, 32>}, {pipeline_mode = #tpu.pipeline_mode<synchronous>, transform_indices = @transform_7, window_bounds = array<i64: 32, 32>}, {pipeline_mode = #tpu.pipeline_mode<synchronous>, transform_indices = @transform_8, window_bounds = array<i64: 1, 32>}, {pipeline_mode = #tpu.pipeline_mode<synchronous>, transform_indices = @transform_9, window_bounds = array<i64: 1, 32>}, {transform_indices = @transform_10, window_bounds = array<i64: 1>}, {transform_indices = @transform_11, window_bounds = array<i64: 1, 1, 2048>}, {transform_indices = @transform_12, window_bounds = array<i64: 1, 8, 1>}]} {
    %c0 = arith.constant 0 : index
    %c0_0 = arith.constant 0 : index
    %c0_1 = arith.constant 0 : index
    %0 = vector.load %arg1[%c0, %c0_0, %c0_1] : memref<1x8x2048xf32, #tpu.memory_space<vmem>>, vector<1x8x2048xf32>
    %1 = vector.shape_cast %0 : vector<1x8x2048xf32> to vector<8x2048xf32>
    %2 = arith.truncf %1 : vector<8x2048xf32> to vector<8x2048xbf16>
    %c0_2 = arith.constant 0 : index
    %c0_3 = arith.constant 0 : index
    %3 = vector.load %arg3[%c0_2, %c0_3] : memref<2048x32xbf16, #tpu.memory_space<vmem>>, vector<2048x32xbf16>
    %cst = arith.constant dense<0.000000e+00> : vector<8x32xf32>
    %4 = tpu.matmul %2, %3, %cst {dimension_numbers = #tpu.dot_dimension_numbers<[1], [0], [0], [1], [0, 0, 1, 1], [], []>} : vector<8x2048xbf16>, vector<2048x32xbf16>, vector<8x32xf32> -> vector<8x32xf32>
    %c0_4 = arith.constant 0 : index
    %c0_5 = arith.constant 0 : index
    %5 = vector.load %arg4[%c0_4, %c0_5] : memref<1x32xf32, #tpu.memory_space<vmem>>, vector<1x32xf32>
    %6 = vector.broadcast %5 : vector<1x32xf32> to vector<8x32xf32>
    %7 = arith.addf %4, %6 : vector<8x32xf32>
    %cst_6 = arith.constant 0.000000e+00 : f32
    %8 = vector.broadcast %cst_6 : f32 to vector<8x32xf32>
    %9 = arith.maximumf %7, %8 : vector<8x32xf32>
    %c0_7 = arith.constant 0 : index
    %c0_8 = arith.constant 0 : index
    %10 = vector.load %arg5[%c0_7, %c0_8] : memref<32x32xf32, #tpu.memory_space<vmem>>, vector<32x32xf32>
    %cst_9 = arith.constant dense<0.000000e+00> : vector<8x32xf32>
    %11 = tpu.matmul %9, %10, %cst_9 {dimension_numbers = #tpu.dot_dimension_numbers<[1], [0], [0], [1], [0, 0, 1, 1], [], []>} : vector<8x32xf32>, vector<32x32xf32>, vector<8x32xf32> -> vector<8x32xf32>
    %c0_10 = arith.constant 0 : index
    %c0_11 = arith.constant 0 : index
    %c0_12 = arith.constant 0 : index
    %12 = vector.load %arg2[%c0_10, %c0_11, %c0_12] : memref<1x1x32xf32, #tpu.memory_space<vmem>>, vector<1x1x32xf32>
    %13 = vector.shape_cast %12 : vector<1x1x32xf32> to vector<1x32xf32>
    %c0_13 = arith.constant 0 : index
    %c0_14 = arith.constant 0 : index
    %14 = vector.load %arg6[%c0_13, %c0_14] : memref<32x32xf32, #tpu.memory_space<vmem>>, vector<32x32xf32>
    %cst_15 = arith.constant dense<0.000000e+00> : vector<1x32xf32>
    %15 = tpu.matmul %13, %14, %cst_15 {dimension_numbers = #tpu.dot_dimension_numbers<[1], [0], [0], [1], [0, 0, 1, 1], [], []>} : vector<1x32xf32>, vector<32x32xf32>, vector<1x32xf32> -> vector<1x32xf32>
    %c0_16 = arith.constant 0 : index
    %c0_17 = arith.constant 0 : index
    %16 = vector.load %arg7[%c0_16, %c0_17] : memref<1x32xf32, #tpu.memory_space<vmem>>, vector<1x32xf32>
    %17 = arith.addf %15, %16 : vector<1x32xf32>
    %cst_18 = arith.constant 0.000000e+00 : f32
    %18 = vector.broadcast %cst_18 : f32 to vector<1x32xf32>
    %19 = arith.maximumf %17, %18 : vector<1x32xf32>
    %c0_19 = arith.constant 0 : index
    %c0_20 = arith.constant 0 : index
    %20 = vector.load %arg8[%c0_19, %c0_20] : memref<32x32xf32, #tpu.memory_space<vmem>>, vector<32x32xf32>
    %cst_21 = arith.constant dense<0.000000e+00> : vector<1x32xf32>
    %21 = tpu.matmul %19, %20, %cst_21 {dimension_numbers = #tpu.dot_dimension_numbers<[1], [0], [0], [1], [0, 0, 1, 1], [], []>} : vector<1x32xf32>, vector<32x32xf32>, vector<1x32xf32> -> vector<1x32xf32>
    %c0_22 = arith.constant 0 : index
    %c0_23 = arith.constant 0 : index
    %22 = vector.load %arg9[%c0_22, %c0_23] : memref<1x32xf32, #tpu.memory_space<vmem>>, vector<1x32xf32>
    %23 = arith.addf %21, %22 : vector<1x32xf32>
    %24 = vector.shape_cast %11 : vector<8x32xf32> to vector<1x8x32xf32>
    %25 = vector.shape_cast %23 : vector<1x32xf32> to vector<1x1x32xf32>
    %26 = vector.broadcast %25 : vector<1x1x32xf32> to vector<1x8x32xf32>
    %27 = arith.addf %24, %26 : vector<1x8x32xf32>
    %28 = math.tanh %27 : vector<1x8x32xf32>
    %c0_24 = arith.constant 0 : index
    %c0_25 = arith.constant 0 : index
    %29 = vector.load %arg10[%c0_24, %c0_25] : memref<1x32xf32, #tpu.memory_space<vmem>>, vector<1x32xf32>
    %30 = vector.shape_cast %29 : vector<1x32xf32> to vector<1x1x32xf32>
    %31 = vector.broadcast %30 : vector<1x1x32xf32> to vector<1x8x32xf32>
    %32 = arith.mulf %28, %31 : vector<1x8x32xf32>
    %cst_26 = arith.constant dense<0.000000e+00> : vector<1x8xf32>
    %33 = vector.multi_reduction <add>, %32, %cst_26 [2] : vector<1x8x32xf32> to vector<1x8xf32>
    %34 = vector.shape_cast %33 : vector<1x8xf32> to vector<1x8x1xf32>
    %c0_27 = arith.constant 0 : index
    %35 = memref.load %arg11[%c0_27] : memref<1xf32, #tpu.memory_space<smem>>
    %36 = vector.broadcast %35 : f32 to vector<1x8x1xf32>
    %37 = arith.addf %34, %36 : vector<1x8x1xf32>
    %cst_28 = arith.constant dense<0xFF800000> : vector<1x1xf32>
    %38 = vector.multi_reduction <maximumf>, %37, %cst_28 [1] : vector<1x8x1xf32> to vector<1x1xf32>
    %39 = vector.shape_cast %38 : vector<1x1xf32> to vector<1x1x1xf32>
    %40 = vector.broadcast %39 : vector<1x1x1xf32> to vector<1x8x1xf32>
    %41 = arith.subf %37, %40 : vector<1x8x1xf32>
    %42 = math.exp %41 : vector<1x8x1xf32>
    %cst_29 = arith.constant dense<0.000000e+00> : vector<1x1xf32>
    %43 = vector.multi_reduction <add>, %42, %cst_29 [1] : vector<1x8x1xf32> to vector<1x1xf32>
    %44 = vector.shape_cast %43 : vector<1x1xf32> to vector<1x1x1xf32>
    %45 = vector.broadcast %44 : vector<1x1x1xf32> to vector<1x8x1xf32>
    %46 = arith.divf %42, %45 : vector<1x8x1xf32>
    %c0_30 = arith.constant 0 : index
    %c0_31 = arith.constant 0 : index
    %c0_32 = arith.constant 0 : index
    %47 = vector.load %arg13[%c0_30, %c0_31, %c0_32] : memref<1x8x1xf32, #tpu.memory_space<vmem>>, vector<1x8x1xf32>
    tpu.vector_store %arg13[%c0_30, %c0_31, %c0_32], %46 {strides = array<i32>} : memref<1x8x1xf32, #tpu.memory_space<vmem>>, vector<1x8x1xf32>,
    %48 = vector.extract_strided_slice %0 {offsets = [0, 0, 0], sizes = [1, 1, 2048], strides = [1, 1, 1]} : vector<1x8x2048xf32> to vector<1x1x2048xf32>
    %49 = vector.extract_strided_slice %46 {offsets = [0, 0, 0], sizes = [1, 1, 1], strides = [1, 1, 1]} : vector<1x8x1xf32> to vector<1x1x1xf32>
    %50 = vector.broadcast %49 : vector<1x1x1xf32> to vector<1x1x2048xf32>
    %51 = arith.mulf %48, %50 : vector<1x1x2048xf32>
    %52 = vector.extract_strided_slice %0 {offsets = [0, 1, 0], sizes = [1, 1, 2048], strides = [1, 1, 1]} : vector<1x8x2048xf32> to vector<1x1x2048xf32>
    %53 = vector.extract_strided_slice %46 {offsets = [0, 1, 0], sizes = [1, 1, 1], strides = [1, 1, 1]} : vector<1x8x1xf32> to vector<1x1x1xf32>
    %54 = vector.broadcast %53 : vector<1x1x1xf32> to vector<1x1x2048xf32>
    %55 = arith.mulf %52, %54 : vector<1x1x2048xf32>
    %56 = arith.addf %51, %55 : vector<1x1x2048xf32>
    %57 = vector.extract_strided_slice %0 {offsets = [0, 2, 0], sizes = [1, 1, 2048], strides = [1, 1, 1]} : vector<1x8x2048xf32> to vector<1x1x2048xf32>
    %58 = vector.extract_strided_slice %46 {offsets = [0, 2, 0], sizes = [1, 1, 1], strides = [1, 1, 1]} : vector<1x8x1xf32> to vector<1x1x1xf32>
    %59 = vector.broadcast %58 : vector<1x1x1xf32> to vector<1x1x2048xf32>
    %60 = arith.mulf %57, %59 : vector<1x1x2048xf32>
    %61 = arith.addf %56, %60 : vector<1x1x2048xf32>
    %62 = vector.extract_strided_slice %0 {offsets = [0, 3, 0], sizes = [1, 1, 2048], strides = [1, 1, 1]} : vector<1x8x2048xf32> to vector<1x1x2048xf32>
    %63 = vector.extract_strided_slice %46 {offsets = [0, 3, 0], sizes = [1, 1, 1], strides = [1, 1, 1]} : vector<1x8x1xf32> to vector<1x1x1xf32>
    %64 = vector.broadcast %63 : vector<1x1x1xf32> to vector<1x1x2048xf32>
    %65 = arith.mulf %62, %64 : vector<1x1x2048xf32>
    %66 = arith.addf %61, %65 : vector<1x1x2048xf32>
    %67 = vector.extract_strided_slice %0 {offsets = [0, 4, 0], sizes = [1, 1, 2048], strides = [1, 1, 1]} : vector<1x8x2048xf32> to vector<1x1x2048xf32>
    %68 = vector.extract_strided_slice %46 {offsets = [0, 4, 0], sizes = [1, 1, 1], strides = [1, 1, 1]} : vector<1x8x1xf32> to vector<1x1x1xf32>
    %69 = vector.broadcast %68 : vector<1x1x1xf32> to vector<1x1x2048xf32>
    %70 = arith.mulf %67, %69 : vector<1x1x2048xf32>
    %71 = arith.addf %66, %70 : vector<1x1x2048xf32>
    %72 = vector.extract_strided_slice %0 {offsets = [0, 5, 0], sizes = [1, 1, 2048], strides = [1, 1, 1]} : vector<1x8x2048xf32> to vector<1x1x2048xf32>
    %73 = vector.extract_strided_slice %46 {offsets = [0, 5, 0], sizes = [1, 1, 1], strides = [1, 1, 1]} : vector<1x8x1xf32> to vector<1x1x1xf32>
    %74 = vector.broadcast %73 : vector<1x1x1xf32> to vector<1x1x2048xf32>
    %75 = arith.mulf %72, %74 : vector<1x1x2048xf32>
    %76 = arith.addf %71, %75 : vector<1x1x2048xf32>
    %77 = vector.extract_strided_slice %0 {offsets = [0, 6, 0], sizes = [1, 1, 2048], strides = [1, 1, 1]} : vector<1x8x2048xf32> to vector<1x1x2048xf32>
    %78 = vector.extract_strided_slice %46 {offsets = [0, 6, 0], sizes = [1, 1, 1], strides = [1, 1, 1]} : vector<1x8x1xf32> to vector<1x1x1xf32>
    %79 = vector.broadcast %78 : vector<1x1x1xf32> to vector<1x1x2048xf32>
    %80 = arith.mulf %77, %79 : vector<1x1x2048xf32>
    %81 = arith.addf %76, %80 : vector<1x1x2048xf32>
    %82 = vector.extract_strided_slice %0 {offsets = [0, 7, 0], sizes = [1, 1, 2048], strides = [1, 1, 1]} : vector<1x8x2048xf32> to vector<1x1x2048xf32>
    %83 = vector.extract_strided_slice %46 {offsets = [0, 7, 0], sizes = [1, 1, 1], strides = [1, 1, 1]} : vector<1x8x1xf32> to vector<1x1x1xf32>
    %84 = vector.broadcast %83 : vector<1x1x1xf32> to vector<1x1x2048xf32>
    %85 = arith.mulf %82, %84 : vector<1x1x2048xf32>
    %86 = arith.addf %81, %85 : vector<1x1x2048xf32>
    %c0_33 = arith.constant 0 : index
    %c0_34 = arith.constant 0 : index
    %c0_35 = arith.constant 0 : index
    %87 = vector.load %arg12[%c0_33, %c0_34, %c0_35] : memref<1x1x2048xf32, #tpu.memory_space<vmem>>, vector<1x1x2048xf32>
    tpu.vector_store %arg12[%c0_33, %c0_34, %c0_35], %86 {strides = array<i32>} : memref<1x1x2048xf32, #tpu.memory_space<vmem>>, vector<1x1x2048xf32>,
    return
  }
  func.func @transform_0(%arg0: i32) -> (i32, i32, i32) {
    %c0_i32 = arith.constant 0 : i32
    %c0_i32_0 = arith.constant 0 : i32
    %c0_i32_1 = arith.constant 0 : i32
    return %arg0, %c0_i32, %c0_i32_0 : i32, i32, i32
  }
  func.func @transform_1(%arg0: i32) -> (i32, i32, i32) {
    %c0_i32 = arith.constant 0 : i32
    %c0_i32_0 = arith.constant 0 : i32
    %c0_i32_1 = arith.constant 0 : i32
    return %arg0, %c0_i32, %c0_i32_0 : i32, i32, i32
  }
  func.func @transform_2(%arg0: i32) -> (i32, i32) {
    %c0_i32 = arith.constant 0 : i32
    %c0_i32_0 = arith.constant 0 : i32
    %c0_i32_1 = arith.constant 0 : i32
    return %c0_i32, %c0_i32_0 : i32, i32
  }
  func.func @transform_3(%arg0: i32) -> (i32, i32) {
    %c0_i32 = arith.constant 0 : i32
    %c0_i32_0 = arith.constant 0 : i32
    %c0_i32_1 = arith.constant 0 : i32
    return %c0_i32, %c0_i32_0 : i32, i32
  }
  func.func @transform_4(%arg0: i32) -> (i32, i32) {
    %c0_i32 = arith.constant 0 : i32
    %c0_i32_0 = arith.constant 0 : i32
    %c0_i32_1 = arith.constant 0 : i32
    return %c0_i32, %c0_i32_0 : i32, i32
  }
  func.func @transform_5(%arg0: i32) -> (i32, i32) {
    %c0_i32 = arith.constant 0 : i32
    %c0_i32_0 = arith.constant 0 : i32
    %c0_i32_1 = arith.constant 0 : i32
    return %c0_i32, %c0_i32_0 : i32, i32
  }
  func.func @transform_6(%arg0: i32) -> (i32, i32) {
    %c0_i32 = arith.constant 0 : i32
    %c0_i32_0 = arith.constant 0 : i32
    %c0_i32_1 = arith.constant 0 : i32
    return %c0_i32, %c0_i32_0 : i32, i32
  }
  func.func @transform_7(%arg0: i32) -> (i32, i32) {
    %c0_i32 = arith.constant 0 : i32
    %c0_i32_0 = arith.constant 0 : i32
    %c0_i32_1 = arith.constant 0 : i32
    return %c0_i32, %c0_i32_0 : i32, i32
  }
  func.func @transform_8(%arg0: i32) -> (i32, i32) {
    %c0_i32 = arith.constant 0 : i32
    %c0_i32_0 = arith.constant 0 : i32
    %c0_i32_1 = arith.constant 0 : i32
    return %c0_i32, %c0_i32_0 : i32, i32
  }
  func.func @transform_9(%arg0: i32) -> (i32, i32) {
    %c0_i32 = arith.constant 0 : i32
    %c0_i32_0 = arith.constant 0 : i32
    %c0_i32_1 = arith.constant 0 : i32
    return %c0_i32, %c0_i32_0 : i32, i32
  }
  func.func @transform_10(%arg0: i32) -> i32 {
    %c0_i32 = arith.constant 0 : i32
    %c0_i32_0 = arith.constant 0 : i32
    return %c0_i32 : i32
  }
  func.func @transform_11(%arg0: i32) -> (i32, i32, i32) {
    %c0_i32 = arith.constant 0 : i32
    %c0_i32_0 = arith.constant 0 : i32
    %c0_i32_1 = arith.constant 0 : i32
    return %arg0, %c0_i32, %c0_i32_0 : i32, i32, i32
  }
  func.func @transform_12(%arg0: i32) -> (i32, i32, i32) {
    %c0_i32 = arith.constant 0 : i32
    %c0_i32_0 = arith.constant 0 : i32
    %c0_i32_1 = arith.constant 0 : i32
    return %arg0, %c0_i32, %c0_i32_0 : i32, i32, i32
  }
}

</mosaic_0001>

<bundles_post_ra>
// kernel: attention_forward.1
= control target key start
LH: loop header
LB: loop body
LE: loop exit
PB: predicated region body
PF: predicated region fallthrough
CT: control target
= control target key end

     0   :  { %s3294_s23 = smov 0   ;;  %s4031_s0 = inlined_call_operand.vmem [shape: f32[2,8,2048], index: 0, kind: input, shape index: {}]   ;;  %s4032_s1 = inlined_call_operand.vmem [shape: f32[2,1,32], index: 1, kind: input, shape index: {}]   ;;  %s4033_s2 = inlined_call_operand.vmem [shape: bf16[2048,32], index: 2, kind: input, shape index: {}]   ;;  %s4034_s3 = inlined_call_operand.vmem [shape: f32[1,32], index: 3, kind: input, shape index: {}]   ;;  %s4035_s4 = inlined_call_operand.vmem [shape: f32[32,32], index: 4, kind: input, shape index: {}]   ;;  %s4036_s5 = inlined_call_operand.vmem [shape: f32[32,32], index: 5, kind: input, shape index: {}]   ;;  %s4037_s6 = inlined_call_operand.vmem [shape: f32[1,32], index: 6, kind: input, shape index: {}]   ;;  %s4038_s7 = inlined_call_operand.vmem [shape: f32[32,32], index: 7, kind: input, shape index: {}]   ;;  %s4039_s8 = inlined_call_operand.vmem [shape: f32[1,32], index: 8, kind: input, shape index: {}]   ;;  %s4040_s9 = inlined_call_operand.vmem [shape: f32[1,32], index: 9, kind: input, shape index: {}]   ;;  %s4041_s10 = inlined_call_operand.<no memory space> [shape: f32[1], index: 10, kind: input, shape index: {}]   ;;  %s4042_s11 = inlined_call_operand.vmem [shape: f32[2,1,2048], index: 11, kind: output, shape index: {0}]   ;;  %s4043_s12 = inlined_call_operand.vmem [shape: f32[2,8,1], index: 12, kind: output, shape index: {1}]  }
   0x1   :  { %18 = sst [smem:[#allocation2]] %s4041_s10 }
   0x2 LB: > { %s2677_s24 = sadd.s32 4294967295, %s3220_s23   ;;  %p2681_p0 = scmp.ge.s32.totalorder %s3220_s23, 1  ;;  %s3220_s23 = sphi %s3294_s23, %s24_s23  }
   0x3   : > { %p374_p1 = scmp.lt.s32.totalorder %s3220_s23, 3 }
   0x5   : > { %p375_p2 = pnand %p2681_p0, %p374_p1 }
   0x7   : > { %378 = sbr.rel (%p375_p2) target bundleno = 873 (0x369), region = 64 }
   0xe   : > { %v3076_v0 = vld [vmem:[%s4033_s2 + $0x40] sm:$0xff]   ;;  %v3080_v4 = vld [vmem:[%s4033_s2 + $0x48] sm:$0xff]   ;;  %v3084_v8 = vld [vmem:[%s4033_s2 + $0x50] sm:$0xff]   ;;  %p422_p3 = scmp.lt.s32.totalorder %s2677_s24, 1  ;;  %vm3223_vm0 = vmmov 0   ;;  %vm1827_vm1 = vcmask 261120  }
   0xf   : > { %v3077_v1 = vld [vmem:[%s4033_s2 + $0xc0] sm:$0xff]   ;;  %2822 = vmatprep.subr.bf16.mxu0 %v3076_v0  ;;  %v3081_v5 = vld [vmem:[%s4033_s2 + $0xc8] sm:$0xff]   ;;  %v3085_v9 = vld [vmem:[%s4033_s2 + $0xd0] sm:$0xff]   ;;  %vm2096_vm2 = vcmask 7168  }
  0x10   : > { %v3078_v2 = vld [vmem:[%s4033_s2] sm:$0xff]   ;;  %2844 = vmatprep.subr.bf16.mxu1 %v3077_v1  ;;  %v3082_v6 = vld [vmem:[%s4033_s2 + $0x8] sm:$0xff]   ;;  %v3086_v10 = vld [vmem:[%s4033_s2 + $0x10] sm:$0xff]   ;;  %s4064_s24 = smov (!%p422_p3, %s2677_s24), 1 }
  0x11   : > { %v3079_v3 = vld [vmem:[%s4033_s2 + $0x80] sm:$0xff]   ;;  %2823 = vmatpush3.bf16.msra.mxu0 %v3078_v2  ;;  %v3083_v7 = vld [vmem:[%s4033_s2 + $0x88] sm:$0xff]   ;;  %v3087_v11 = vld [vmem:[%s4033_s2 + $0x90] sm:$0xff]   ;;  %s2821_s27 = sshll.u32 %s4064_s24, 7  ;;  %s429_s16 = scalar_lea.vmem %s4032_s1, %s4064_s24 }
  0x12   : > { %2845 = vmatpush3.bf16.msra.mxu1 %v3079_v3  ;;  %2824 = vmatprep.subr.bf16.mxu0 %v3080_v4  ;;  %v3088_v12 = vld [vmem:[%s4033_s2 + $0x58] sm:$0xff]   ;;  %v3092_v16 = vld [vmem:[%s4033_s2 + $0x60] sm:$0xff]   ;;  %v3096_v20 = vld [vmem:[%s4033_s2 + $0x68] sm:$0xff]   ;;  %s3402_s18 = scalar_lea.vmem %s4031_s0, %s2821_s27  ;;  %s2076_s27 = sld [smem:[#allocation2]] }
  0x13   : > { %2846 = vmatprep.subr.bf16.mxu1 %v3081_v5  ;;  %v3089_v13 = vld [vmem:[%s4033_s2 + $0xd8] sm:$0xff]   ;;  %v3093_v17 = vld [vmem:[%s4033_s2 + $0xe0] sm:$0xff]   ;;  %v3097_v21 = vld [vmem:[%s4033_s2 + $0xe8] sm:$0xff]   ;;  %s2685_s28 = sshll.u32 %s4064_s24, 3 }
  0x14   : > { %v3090_v14 = vld [vmem:[%s4033_s2 + $0x18] sm:$0xff]   ;;  %v3094_v18 = vld [vmem:[%s4033_s2 + $0x20] sm:$0xff]   ;;  %v3098_v22 = vld [vmem:[%s4033_s2 + $0x28] sm:$0xff]   ;;  %s437_s13 = scalar_lea.vmem %s4043_s12, %s2685_s28 }
  0x15   : > { %2825 = vmatpush3.bf16.msra.mxu0 %v3082_v6  ;;  %v3091_v15 = vld [vmem:[%s4033_s2 + $0x98] sm:$0xff]   ;;  %v3095_v19 = vld [vmem:[%s4033_s2 + $0xa0] sm:$0xff]   ;;  %v3099_v23 = vld [vmem:[%s4033_s2 + $0xa8] sm:$0xff]  }
  0x16   : > { %2847 = vmatpush3.bf16.msra.mxu1 %v3083_v7  ;;  %2826 = vmatprep.subr.bf16.mxu0 %v3084_v8  ;;  %v3100_v24 = vld [vmem:[%s4033_s2 + $0x70] sm:$0xff]   ;;  %v3104_v28 = vld [vmem:[%s4033_s2 + $0x78] sm:$0xff]   ;;  %v440_v32 = vld [vmem:[%s3402_s18 + $0x8] sm:$0xff] }
  0x17   : > { %2848 = vmatprep.subr.bf16.mxu1 %v3085_v9  ;;  %v3101_v25 = vld [vmem:[%s4033_s2 + $0xf0] sm:$0xff]   ;;  %v3105_v29 = vld [vmem:[%s4033_s2 + $0xf8] sm:$0xff]   ;;  %v439_v34 = vld [vmem:[%s3402_s18] sm:$0xff]  ;;  %v456_v35 = vpack.c.bf16 %v440_v32, %v440_v32 }
  0x18   : > { %v3102_v26 = vld [vmem:[%s4033_s2 + $0x30] sm:$0xff]   ;;  %v3106_v30 = vld [vmem:[%s4033_s2 + $0x38] sm:$0xff]   ;;  %v455_v37 = vpack.c.bf16 %v439_v34, %v439_v34  ;;  %v3108_v40 = vld [vmem:[%s4033_s2 + $0x140] sm:$0xff]  }
  0x19   : > { %2827 = vmatpush3.bf16.msra.mxu0 %v3086_v10  ;;  %v3103_v27 = vld [vmem:[%s4033_s2 + $0xb0] sm:$0xff]   ;;  %v3107_v31 = vld [vmem:[%s4033_s2 + $0xb8] sm:$0xff]   ;;  %1534 = vmatprep.mubr.bf16.mxu0 %v456_v35  ;;  %v3109_v41 = vld [vmem:[%s4033_s2 + $0x1c0] sm:$0xff]  }
  0x1a   : > { %2849 = vmatpush3.bf16.msra.mxu1 %v3087_v11  ;;  %2828 = vmatprep.subr.bf16.mxu0 %v3088_v12  ;;  %v442_v33 = vld [vmem:[%s3402_s18 + $0x18] sm:$0xff]  ;;  %v441_v38 = vld [vmem:[%s3402_s18 + $0x10] sm:$0xff]  ;;  %v3110_v42 = vld [vmem:[%s4033_s2 + $0x100] sm:$0xff]  }
  0x1b   : > { %2850 = vmatprep.subr.bf16.mxu1 %v3089_v13  ;;  %v458_v36 = vpack.c.bf16 %v442_v33, %v442_v33  ;;  %v457_v39 = vpack.c.bf16 %v441_v38, %v441_v38  ;;  %v3111_v43 = vld [vmem:[%s4033_s2 + $0x180] sm:$0xff]   ;;  %v3112_v44 = vld [vmem:[%s4033_s2 + $0x148] sm:$0xff]   ;;  %v3116_v48 = vld [vmem:[%s4033_s2 + $0x150] sm:$0xff]  }
  0x1c   : > { %v3113_v45 = vld [vmem:[%s4033_s2 + $0x1c8] sm:$0xff]   ;;  %v3117_v49 = vld [vmem:[%s4033_s2 + $0x1d0] sm:$0xff]   ;;  %v3120_v52 = vld [vmem:[%s4033_s2 + $0x158] sm:$0xff]  }
  0x1d   : > { %2829 = vmatpush3.bf16.msra.mxu0 %v3090_v14  ;;  %1574 = vmatprep.mubr.bf16.mxu1 %v458_v36  ;;  %v3114_v46 = vld [vmem:[%s4033_s2 + $0x108] sm:$0xff]   ;;  %v3118_v50 = vld [vmem:[%s4033_s2 + $0x110] sm:$0xff]   ;;  %v3121_v53 = vld [vmem:[%s4033_s2 + $0x1d8] sm:$0xff]  }
  0x1e   : > { %2851 = vmatpush3.bf16.msra.mxu1 %v3091_v15  ;;  %2830 = vmatprep.subr.bf16.mxu0 %v3092_v16  ;;  %v3115_v47 = vld [vmem:[%s4033_s2 + $0x188] sm:$0xff]   ;;  %v3119_v51 = vld [vmem:[%s4033_s2 + $0x190] sm:$0xff]   ;;  %v3122_v54 = vld [vmem:[%s4033_s2 + $0x118] sm:$0xff]  }
  0x1f   : > { %2852 = vmatprep.subr.bf16.mxu1 %v3093_v17  ;;  %v3123_v55 = vld [vmem:[%s4033_s2 + $0x198] sm:$0xff]   ;;  %v3124_v56 = vld [vmem:[%s4033_s2 + $0x160] sm:$0xff]   ;;  %v3128_v60 = vld [vmem:[%s4033_s2 + $0x168] sm:$0xff]  }
  0x20   : > { %v3125_v57 = vld [vmem:[%s4033_s2 + $0x1e0] sm:$0xff]   ;;  %v3129_v61 = vld [vmem:[%s4033_s2 + $0x1e8] sm:$0xff]   ;;  %v3132_v0 = vld [vmem:[%s4033_s2 + $0x170] sm:$0xff]  }
  0x21   : > { %2831 = vmatpush3.bf16.msra.mxu0 %v3094_v18  ;;  %v3126_v58 = vld [vmem:[%s4033_s2 + $0x120] sm:$0xff]   ;;  %v3130_v62 = vld [vmem:[%s4033_s2 + $0x128] sm:$0xff]   ;;  %v3133_v1 = vld [vmem:[%s4033_s2 + $0x1f0] sm:$0xff]  }
  0x22   : > { %2853 = vmatpush3.bf16.msra.mxu1 %v3095_v19  ;;  %2832 = vmatprep.subr.bf16.mxu0 %v3096_v20  ;;  %v3127_v59 = vld [vmem:[%s4033_s2 + $0x1a0] sm:$0xff]   ;;  %v3131_v63 = vld [vmem:[%s4033_s2 + $0x1a8] sm:$0xff]   ;;  %v3134_v2 = vld [vmem:[%s4033_s2 + $0x130] sm:$0xff]  }
  0x23   : > { %2854 = vmatprep.subr.bf16.mxu1 %v3097_v21  ;;  %v3135_v3 = vld [vmem:[%s4033_s2 + $0x1b0] sm:$0xff]   ;;  %v3136_v4 = vld [vmem:[%s4033_s2 + $0x178] sm:$0xff]   ;;  %v3511_v8 = vld [vmem:[%s3402_s18 + $0x28] sm:$0xff] }
  0x24   : > { %v3137_v5 = vld [vmem:[%s4033_s2 + $0x1f8] sm:$0xff]   ;;  %v460_v10 = vpack.c.bf16 %v3511_v8, %v3511_v8  ;;  %v3521_v12 = vld [vmem:[%s3402_s18 + $0x20] sm:$0xff]  ;;  %v3524_v13 = vld [vmem:[%s3402_s18 + $0x30] sm:$0xff] }
  0x25   : > { %2833 = vmatpush3.bf16.msra.mxu0 %v3098_v22  ;;  %v3138_v6 = vld [vmem:[%s4033_s2 + $0x138] sm:$0xff]   ;;  %v459_v14 = vpack.c.bf16 %v3521_v12, %v3521_v12  ;;  %v461_v15 = vpack.c.bf16 %v3524_v13, %v3524_v13  ;;  %v3140_v16 = vld [vmem:[%s4033_s2 + $0x240] sm:$0xff]   ;;  %v3144_v20 = vld [vmem:[%s4033_s2 + $0x248] sm:$0xff]  }
  0x26   : > { %2855 = vmatpush3.bf16.msra.mxu1 %v3099_v23  ;;  %2834 = vmatprep.subr.bf16.mxu0 %v3100_v24  ;;  %v3139_v7 = vld [vmem:[%s4033_s2 + $0x1b8] sm:$0xff]   ;;  %v3141_v17 = vld [vmem:[%s4033_s2 + $0x2c0] sm:$0xff]   ;;  %v3145_v21 = vld [vmem:[%s4033_s2 + $0x2c8] sm:$0xff]  }
  0x27   : > { %2856 = vmatprep.subr.bf16.mxu1 %v3101_v25  ;;  %v3514_v9 = vld [vmem:[%s3402_s18 + $0x38] sm:$0xff]  ;;  %v3142_v18 = vld [vmem:[%s4033_s2 + $0x200] sm:$0xff]   ;;  %v3146_v22 = vld [vmem:[%s4033_s2 + $0x208] sm:$0xff]  }
  0x28   : > { %v462_v11 = vpack.c.bf16 %v3514_v9, %v3514_v9  ;;  %v3143_v19 = vld [vmem:[%s4033_s2 + $0x280] sm:$0xff]   ;;  %v3147_v23 = vld [vmem:[%s4033_s2 + $0x288] sm:$0xff]   ;;  %v3148_v24 = vld [vmem:[%s4033_s2 + $0x250] sm:$0xff]  }
  0x29   : > { %2835 = vmatpush3.bf16.msra.mxu0 %v3102_v26  ;;  %v3149_v25 = vld [vmem:[%s4033_s2 + $0x2d0] sm:$0xff]   ;;  %v3156_v32 = vld [vmem:[%s4033_s2 + $0x260] sm:$0xff]   ;;  %v3160_v36 = vld [vmem:[%s4033_s2 + $0x268] sm:$0xff]  }
  0x2a   : > { %2857 = vmatpush3.bf16.msra.mxu1 %v3103_v27  ;;  %2836 = vmatprep.subr.bf16.mxu0 %v3104_v28  ;;  %v3150_v26 = vld [vmem:[%s4033_s2 + $0x210] sm:$0xff]   ;;  %v3152_v28 = vld [vmem:[%s4033_s2 + $0x258] sm:$0xff]   ;;  %v3157_v33 = vld [vmem:[%s4033_s2 + $0x2e0] sm:$0xff]  }
  0x2b   : > { %2858 = vmatprep.subr.bf16.mxu1 %v3105_v29  ;;  %v3151_v27 = vld [vmem:[%s4033_s2 + $0x290] sm:$0xff]   ;;  %v3153_v29 = vld [vmem:[%s4033_s2 + $0x2d8] sm:$0xff]   ;;  %v3158_v34 = vld [vmem:[%s4033_s2 + $0x220] sm:$0xff]  }
  0x2c   : > { %v3159_v35 = vld [vmem:[%s4033_s2 + $0x2a0] sm:$0xff]   ;;  %v3162_v38 = vld [vmem:[%s4033_s2 + $0x228] sm:$0xff]  }
  0x2d   : > { %2837 = vmatpush3.bf16.msra.mxu0 %v3106_v30  ;;  %v3154_v30 = vld [vmem:[%s4033_s2 + $0x218] sm:$0xff]  }
  0x2e   : > { %2859 = vmatpush3.bf16.msra.mxu1 %v3107_v31  ;;  %2866 = vmatprep.subr.bf16.mxu0 %v3108_v40  ;;  %v3155_v31 = vld [vmem:[%s4033_s2 + $0x298] sm:$0xff]   ;;  %v3164_v40 = vld [vmem:[%s4033_s2 + $0x270] sm:$0xff]  }
  0x2f   : > { %2888 = vmatprep.subr.bf16.mxu1 %v3109_v41  ;;  %v3165_v41 = vld [vmem:[%s4033_s2 + $0x2f0] sm:$0xff]  }
  0x30   : > { %1535 = vmatmul.mubr.bf16.vlgmr.msra.gmra.mrb[0].mxu0 %v455_v37  ;;  %v3161_v37 = vld [vmem:[%s4033_s2 + $0x2e8] sm:$0xff]  }
  0x31   : > { %1575 = vmatmul.mubr.bf16.vlgmr.msra.gmra.mrb[0].mxu1 %v457_v39  ;;  %2867 = vmatpush3.bf16.msra.mxu0 %v3110_v42  ;;  %v3163_v39 = vld [vmem:[%s4033_s2 + $0x2a8] sm:$0xff]   ;;  %v3166_v42 = vld [vmem:[%s4033_s2 + $0x230] sm:$0xff]  }
  0x32   : > { %2889 = vmatpush3.bf16.msra.mxu1 %v3111_v43  ;;  %2868 = vmatprep.subr.bf16.mxu0 %v3112_v44  ;;  %v3167_v43 = vld [vmem:[%s4033_s2 + $0x2b0] sm:$0xff]   ;;  %v3168_v44 = vld [vmem:[%s4033_s2 + $0x278] sm:$0xff]  }
  0x33   : > { %2890 = vmatprep.subr.bf16.mxu1 %v3113_v45  ;;  %1614 = vmatprep.mubr.bf16.mxu0 %v460_v10  ;;  %v3169_v45 = vld [vmem:[%s4033_s2 + $0x2f8] sm:$0xff]   ;;  %v3188_v10 = vld [vmem:[%s4033_s2 + $0x360] sm:$0xff]  }
  0x34   : > { %1654 = vmatprep.mubr.bf16.mxu1 %v462_v11  ;;  %v3189_v11 = vld [vmem:[%s4033_s2 + $0x3e0] sm:$0xff]  }
  0x35   : > { %2869 = vmatpush3.bf16.msra.mxu0 %v3114_v46  ;;  %v3170_v46 = vld [vmem:[%s4033_s2 + $0x238] sm:$0xff]  }
  0x36   : > { %2891 = vmatpush3.bf16.msra.mxu1 %v3115_v47  ;;  %2870 = vmatprep.subr.bf16.mxu0 %v3116_v48  ;;  %v3171_v47 = vld [vmem:[%s4033_s2 + $0x2b8] sm:$0xff]   ;;  %v3627_v48 = vld [vmem:[%s3402_s18 + $0x48] sm:$0xff] }
  0x37   : > { %2892 = vmatprep.subr.bf16.mxu1 %v3117_v49  ;;  %v464_v49 = vpack.c.bf16 %v3627_v48, %v3627_v48 }
  0x39   : > { %2871 = vmatpush3.bf16.msra.mxu0 %v3118_v50  ;;  %v3632_v50 = vld [vmem:[%s3402_s18 + $0x58] sm:$0xff] }
  0x3a   : > { %2893 = vmatpush3.bf16.msra.mxu1 %v3119_v51  ;;  %2872 = vmatprep.subr.bf16.mxu0 %v3120_v52  ;;  %v3635_v51 = vld [vmem:[%s3402_s18 + $0x40] sm:$0xff]  ;;  %v3638_v52 = vld [vmem:[%s3402_s18 + $0x50] sm:$0xff] }
  0x3b   : > { %2894 = vmatprep.subr.bf16.mxu1 %v3121_v53  ;;  %v466_v53 = vpack.c.bf16 %v3632_v50, %v3632_v50 }
  0x3d   : > { %2873 = vmatpush3.bf16.msra.mxu0 %v3122_v54  ;;  %v463_v54 = vpack.c.bf16 %v3635_v51, %v3635_v51 }
  0x3e   : > { %2895 = vmatpush3.bf16.msra.mxu1 %v3123_v55  ;;  %2874 = vmatprep.subr.bf16.mxu0 %v3124_v56  ;;  %v465_v55 = vpack.c.bf16 %v3638_v52, %v3638_v52  ;;  %v3172_v56 = vld [vmem:[%s4033_s2 + $0x340] sm:$0xff]  }
  0x3f   : > { %2896 = vmatprep.subr.bf16.mxu1 %v3125_v57  ;;  %v3173_v57 = vld [vmem:[%s4033_s2 + $0x3c0] sm:$0xff]  }
  0x41   : > { %2875 = vmatpush3.bf16.msra.mxu0 %v3126_v58  ;;  %v3174_v58 = vld [vmem:[%s4033_s2 + $0x300] sm:$0xff]  }
  0x42   : > { %2897 = vmatpush3.bf16.msra.mxu1 %v3127_v59  ;;  %2876 = vmatprep.subr.bf16.mxu0 %v3128_v60  ;;  %v3175_v59 = vld [vmem:[%s4033_s2 + $0x380] sm:$0xff]   ;;  %v3176_v60 = vld [vmem:[%s4033_s2 + $0x348] sm:$0xff]  }
  0x43   : > { %2898 = vmatprep.subr.bf16.mxu1 %v3129_v61  ;;  %v3177_v61 = vld [vmem:[%s4033_s2 + $0x3c8] sm:$0xff]  }
  0x45   : > { %2877 = vmatpush3.bf16.msra.mxu0 %v3130_v62  ;;  %v3178_v62 = vld [vmem:[%s4033_s2 + $0x308] sm:$0xff]  }
  0x46   : > { %2899 = vmatpush3.bf16.msra.mxu1 %v3131_v63  ;;  %2878 = vmatprep.subr.bf16.mxu0 %v3132_v0  ;;  %v3179_v63 = vld [vmem:[%s4033_s2 + $0x388] sm:$0xff]   ;;  %v3180_v0 = vld [vmem:[%s4033_s2 + $0x350] sm:$0xff]  }
  0x47   : > { %2900 = vmatprep.subr.bf16.mxu1 %v3133_v1  ;;  %v3181_v1 = vld [vmem:[%s4033_s2 + $0x3d0] sm:$0xff]  }
  0x49   : > { %2879 = vmatpush3.bf16.msra.mxu0 %v3134_v2  ;;  %v3182_v2 = vld [vmem:[%s4033_s2 + $0x310] sm:$0xff]  }
  0x4a   : > { %2901 = vmatpush3.bf16.msra.mxu1 %v3135_v3  ;;  %2880 = vmatprep.subr.bf16.mxu0 %v3136_v4  ;;  %v3183_v3 = vld [vmem:[%s4033_s2 + $0x390] sm:$0xff]   ;;  %v3184_v4 = vld [vmem:[%s4033_s2 + $0x358] sm:$0xff]  }
  0x4b   : > { %2902 = vmatprep.subr.bf16.mxu1 %v3137_v5  ;;  %v3185_v5 = vld [vmem:[%s4033_s2 + $0x3d8] sm:$0xff]  }
  0x4d   : > { %2881 = vmatpush3.bf16.msra.mxu0 %v3138_v6  ;;  %v3186_v6 = vld [vmem:[%s4033_s2 + $0x318] sm:$0xff]  }
  0x4e   : > { %2903 = vmatpush3.bf16.msra.mxu1 %v3139_v7  ;;  %2910 = vmatprep.subr.bf16.mxu0 %v3140_v16  ;;  %v3187_v7 = vld [vmem:[%s4033_s2 + $0x398] sm:$0xff]   ;;  %v3192_v16 = vld [vmem:[%s4033_s2 + $0x368] sm:$0xff]  }
  0x4f   : > { %2932 = vmatprep.subr.bf16.mxu1 %v3141_v17  ;;  %v3193_v17 = vld [vmem:[%s4033_s2 + $0x3e8] sm:$0xff]  }
  0x50   : > { %1615 = vmatmul.mubr.bf16.vlgmr.msra.gmra.mrb[4].mxu0 %v459_v14  ;;  %v3190_v14 = vld [vmem:[%s4033_s2 + $0x320] sm:$0xff]  }
  0x51   : > { %1655 = vmatmul.mubr.bf16.vlgmr.msra.gmra.mrb[4].mxu1 %v461_v15  ;;  %2911 = vmatpush3.bf16.msra.mxu0 %v3142_v18  ;;  %v3191_v15 = vld [vmem:[%s4033_s2 + $0x3a0] sm:$0xff]   ;;  %v3194_v18 = vld [vmem:[%s4033_s2 + $0x328] sm:$0xff]  }
  0x52   : > { %2933 = vmatpush3.bf16.msra.mxu1 %v3143_v19  ;;  %2912 = vmatprep.subr.bf16.mxu0 %v3144_v20  ;;  %v3195_v19 = vld [vmem:[%s4033_s2 + $0x3a8] sm:$0xff]   ;;  %v3196_v20 = vld [vmem:[%s4033_s2 + $0x370] sm:$0xff]  }
  0x53   : > { %2934 = vmatprep.subr.bf16.mxu1 %v3145_v21  ;;  %1694 = vmatprep.mubr.bf16.mxu0 %v464_v49  ;;  %v3197_v21 = vld [vmem:[%s4033_s2 + $0x3f0] sm:$0xff]  }
  0x54   : > { %1734 = vmatprep.mubr.bf16.mxu1 %v466_v53  ;;  %v1825_v49 = vld [vmem:[%s4035_s4 + $0x10] sm:$0xff]  ;;  %v1826_v53 = vld [vmem:[%s4035_s4 + $0x18] sm:$0xff] }
  0x55   : > { %2913 = vmatpush3.bf16.msra.mxu0 %v3146_v22  ;;  %v3198_v22 = vld [vmem:[%s4033_s2 + $0x330] sm:$0xff]  }
  0x56   : > { %2935 = vmatpush3.bf16.msra.mxu1 %v3147_v23  ;;  %2914 = vmatprep.subr.bf16.mxu0 %v3148_v24  ;;  %v3199_v23 = vld [vmem:[%s4033_s2 + $0x3b0] sm:$0xff]   ;;  %v3200_v24 = vld [vmem:[%s4033_s2 + $0x378] sm:$0xff]  }
  0x57   : > { %2936 = vmatprep.subr.bf16.mxu1 %v3149_v25  ;;  %v3201_v25 = vld [vmem:[%s4033_s2 + $0x3f8] sm:$0xff]  }
  0x59   : > { %2915 = vmatpush3.bf16.msra.mxu0 %v3150_v26  ;;  %v3202_v26 = vld [vmem:[%s4033_s2 + $0x338] sm:$0xff]  }
  0x5a   : > { %2937 = vmatpush3.bf16.msra.mxu1 %v3151_v27  ;;  %2916 = vmatprep.subr.bf16.mxu0 %v3152_v28  ;;  %v3203_v27 = vld [vmem:[%s4033_s2 + $0x3b8] sm:$0xff]   ;;  %v3743_v28 = vld [vmem:[%s3402_s18 + $0x68] sm:$0xff] }
  0x5b   : > { %2938 = vmatprep.subr.bf16.mxu1 %v3153_v29  ;;  %v3746_v29 = vld [vmem:[%s3402_s18 + $0x78] sm:$0xff] }
  0x5d   : > { %2917 = vmatpush3.bf16.msra.mxu0 %v3154_v30  ;;  %v3749_v30 = vld [vmem:[%s3402_s18 + $0x60] sm:$0xff] }
  0x5e   : > { %2939 = vmatpush3.bf16.msra.mxu1 %v3155_v31  ;;  %2918 = vmatprep.subr.bf16.mxu0 %v3156_v32  ;;  %v468_v31 = vpack.c.bf16 %v3743_v28, %v3743_v28  ;;  %v470_v32 = vpack.c.bf16 %v3746_v29, %v3746_v29 }
  0x5f   : > { %2940 = vmatprep.subr.bf16.mxu1 %v3157_v33  ;;  %v467_v33 = vpack.c.bf16 %v3749_v30, %v3749_v30 }
  0x61   : > { %2919 = vmatpush3.bf16.msra.mxu0 %v3158_v34  ;;  %v3758_v34 = vld [vmem:[%s3402_s18 + $0x70] sm:$0xff] }
  0x62   : > { %2941 = vmatpush3.bf16.msra.mxu1 %v3159_v35  ;;  %2920 = vmatprep.subr.bf16.mxu0 %v3160_v36  ;;  %v1902_v35 = vld [vmem:[%s4036_s5] sm:$0xff]  ;;  %v1903_v36 = vld [vmem:[%s4036_s5 + $0x8] sm:$0xff] }
  0x63   : > { %2942 = vmatprep.subr.bf16.mxu1 %v3161_v37  ;;  %v3222_v37 = vmov 0.0|0.0  }
  0x65   : > { %2921 = vmatpush3.bf16.msra.mxu0 %v3162_v38  ;;  %v469_v38 = vpack.c.bf16 %v3758_v34, %v3758_v34 }
  0x66   : > { %2943 = vmatpush3.bf16.msra.mxu1 %v3163_v39  ;;  %2922 = vmatprep.subr.bf16.mxu0 %v3164_v40  ;;  %v3053_v39 = vpack.c.bf16 %v1903_v36, %v1902_v35  ;;  %v1904_v40 = vld [vmem:[%s4036_s5 + $0x10] sm:$0xff] }
  0x67   : > { %2944 = vmatprep.subr.bf16.mxu1 %v3165_v41  ;;  %v1905_v41 = vld [vmem:[%s4036_s5 + $0x18] sm:$0xff] }
  0x69   : > { %2923 = vmatpush3.bf16.msra.mxu0 %v3166_v42  ;;  %v3056_v42 = vpack.c.bf16 %v1905_v41, %v1904_v40 }
  0x6a   : > { %2945 = vmatpush3.bf16.msra.mxu1 %v3167_v43  ;;  %2924 = vmatprep.subr.bf16.mxu0 %v3168_v44  ;;  %v3224_v43 = vmov 0.0   ;;  %v1901_v44 = vld [vmem:[%s429_s16] sm:$0x1] }
  0x6b   : > { %2946 = vmatprep.subr.bf16.mxu1 %v3169_v45  ;;  %v1823_v45 = vld [vmem:[%s4035_s4] sm:$0xff] }
  0x6d   : > { %2925 = vmatpush3.bf16.msra.mxu0 %v3170_v46  ;;  %v1824_v46 = vld [vmem:[%s4035_s4 + $0x8] sm:$0xff] }
  0x6e   : > { %2947 = vmatpush3.bf16.msra.mxu1 %v3171_v47  ;;  %2954 = vmatprep.subr.bf16.mxu0 %v3172_v56  ;;  %v3047_v47 = vpack.c.bf16 %v1824_v46, %v1823_v45 }
  0x6f   : > { %2976 = vmatprep.subr.bf16.mxu1 %v3173_v57  ;;  %v2686_v57 = vld [vmem:[%s4034_s3] ss:$0 sm:$0xff] }
  0x70   : > { %1695 = vmatmul.mubr.bf16.vlgmr.msra.gmra.mrb[8].mxu0 %v463_v54  ;;  %v3050_v54 = vpack.c.bf16 %v1826_v53, %v1825_v49  ;;  %v1981_v53 = vld [vmem:[%s4038_s7] sm:$0xff] }
  0x71   : > { %1735 = vmatmul.mubr.bf16.vlgmr.msra.gmra.mrb[8].mxu1 %v465_v55  ;;  %2955 = vmatpush3.bf16.msra.mxu0 %v3174_v58 }
  0x72   : > { %2977 = vmatpush3.bf16.msra.mxu1 %v3175_v59  ;;  %2956 = vmatprep.subr.bf16.mxu0 %v3176_v60 }
  0x73   : > { %2978 = vmatprep.subr.bf16.mxu1 %v3177_v61  ;;  %1774 = vmatprep.mubr.bf16.mxu0 %v468_v31 }
  0x74   : > { %1814 = vmatprep.mubr.bf16.mxu1 %v470_v32 }
  0x75   : > { %2957 = vmatpush3.bf16.msra.mxu0 %v3178_v62 }
  0x76   : > { %2979 = vmatpush3.bf16.msra.mxu1 %v3179_v63  ;;  %2958 = vmatprep.subr.bf16.mxu0 %v3180_v0 }
  0x77   : > { %2980 = vmatprep.subr.bf16.mxu1 %v3181_v1 }
  0x79   : > { %2959 = vmatpush3.bf16.msra.mxu0 %v3182_v2 }
  0x7a   : > { %2981 = vmatpush3.bf16.msra.mxu1 %v3183_v3  ;;  %2960 = vmatprep.subr.bf16.mxu0 %v3184_v4 }
  0x7b   : > { %2982 = vmatprep.subr.bf16.mxu1 %v3185_v5 }
  0x7d   : > { %2961 = vmatpush3.bf16.msra.mxu0 %v3186_v6 }
  0x7e   : > { %2983 = vmatpush3.bf16.msra.mxu1 %v3187_v7  ;;  %2962 = vmatprep.subr.bf16.mxu0 %v3188_v10 }
  0x7f   : > { %2984 = vmatprep.subr.bf16.mxu1 %v3189_v11 }
  0x81   : > { %2963 = vmatpush3.bf16.msra.mxu0 %v3190_v14 }
  0x82   : > { %2985 = vmatpush3.bf16.msra.mxu1 %v3191_v15  ;;  %2964 = vmatprep.subr.bf16.mxu0 %v3192_v16 }
  0x83   : > { %2986 = vmatprep.subr.bf16.mxu1 %v3193_v17 }
  0x85   : > { %2965 = vmatpush3.bf16.msra.mxu0 %v3194_v18 }
  0x86   : > { %2987 = vmatpush3.bf16.msra.mxu1 %v3195_v19  ;;  %2966 = vmatprep.subr.bf16.mxu0 %v3196_v20 }
  0x87   : > { %2988 = vmatprep.subr.bf16.mxu1 %v3197_v21 }
  0x89   : > { %2967 = vmatpush3.bf16.msra.mxu0 %v3198_v22 }
  0x8a   : > { %2989 = vmatpush3.bf16.msra.mxu1 %v3199_v23  ;;  %2968 = vmatprep.subr.bf16.mxu0 %v3200_v24 }
  0x8b   : > { %2990 = vmatprep.subr.bf16.mxu1 %v3201_v25 }
  0x8d   : > { %2969 = vmatpush3.bf16.msra.mxu0 %v3202_v26 }
  0x8e   : > { %2991 = vmatpush3.bf16.msra.mxu1 %v3203_v27  ;;  %3046 = vmatprep.subr.bf16.mxu0 %v3222_v37 }
  0x8f   : > { %3052 = vmatprep.subr.bf16.mxu1 %v3222_v37 }
  0x90   : > { %1775 = vmatmul.mubr.bf16.vlgmr.msra.gmra.mrb[12].mxu0 %v467_v33 }
  0x91   : > { %1815 = vmatmul.mubr.bf16.vlgmr.msra.gmra.mrb[12].mxu1 %v469_v38  ;;  %3021 = vmatprep.mubr.msk.f32.mxu0 %vm3223_vm0, %v3224_v43 }
  0x92   : > { %3054 = vmatpush3.bf16.msra.mxu1 %v3053_v39  ;;  %3032 = vmatprep.mubr.msk.f32.mxu1 %vm3223_vm0, %v3224_v43 }
  0x93   : > { %3055 = vmatprep.subr.bf16.mxu1 %v3222_v37  ;;  %3048 = vmatpush3.bf16.msra.mxu0 %v3047_v47 }
  0x94   : > { %3049 = vmatprep.subr.bf16.mxu0 %v3222_v37 }
  0x96   : > { %3057 = vmatpush3.bf16.msra.mxu1 %v3056_v42 }
  0x97   : > { %3051 = vmatpush3.bf16.msra.mxu0 %v3050_v54  ;;  %v1982_v54 = vld [vmem:[%s4038_s7 + $0x8] sm:$0xff] }
  0x98   : > { %3058 = vmatprep.subr.bf16.mxu0 %v3222_v37 }
  0x99   : > { %3033 = vmatmul.mubr.msk.f32.vlgmr.msra.gmra.mrb[16].mxu1 %vm1827_vm1, %v1901_v44 }
 0x103   : > { %v2838_v55 = vpop.f32.mrb[0].mxu0 }
 0x104   : > { %v2860_v56 = vpop.f32.mrb[0].mxu1  ;;  %v2839_v58 = vpop.f32.mrb[1].mxu0 }
 0x105   : > { %v2861_v59 = vpop.f32.mrb[1].mxu1  ;;  %v2840_v60 = vadd.f32 %v2839_v58, %v2838_v55  ;;  %v2841_v62 = vpop.f32.mrb[2].mxu0 }
 0x106   : > { %v2862_v61 = vadd.f32 %v2861_v59, %v2860_v56  ;;  %v2863_v63 = vpop.f32.mrb[2].mxu1  ;;  %v2842_v0 = vpop.f32.mrb[3].mxu0  ;;  %v3059_v56 = vpack.c.bf16 %v1982_v54, %v1981_v53  ;;  %v3210_v53 = vld [vmem:[%s3402_s18] sm:$0xff] }
 0x107   : > { %v2864_v1 = vpop.f32.mrb[3].mxu1  ;;  %v1537_v2 = vadd.f32 %v2840_v60, %v2686_v57  ;;  %v1906_v57 = vld [vmem:[%s4037_s6] sm:$0x1]  ;;  %v1983_v60 = vld [vmem:[%s4038_s7 + $0x10] sm:$0xff] }
 0x109   : > { %v1577_v3 = vadd.f32 %v2862_v61, %v1537_v2  ;;  %v1984_v61 = vld [vmem:[%s4038_s7 + $0x18] sm:$0xff]  ;;  %v2059_v2 = vlaneseq }
 0x10a   : > { %v3062_v0 = vpack.c.bf16 %v1984_v61, %v1983_v60 }
 0x123   : > { %v2882_v4 = vpop.f32.mrb[4].mxu0 }
 0x124   : > { %v2904_v5 = vpop.f32.mrb[4].mxu1  ;;  %v2883_v6 = vpop.f32.mrb[5].mxu0 }
 0x125   : > { %v2884_v7 = vadd.f32 %v2883_v6, %v2882_v4  ;;  %v2905_v10 = vpop.f32.mrb[5].mxu1  ;;  %v2885_v11 = vpop.f32.mrb[6].mxu0  ;;  %v1985_v6 = vld [vmem:[%s4039_s8] sm:$0x1] }
 0x126   : > { %v2906_v14 = vadd.f32 %v2905_v10, %v2904_v5  ;;  %v2907_v15 = vpop.f32.mrb[6].mxu1  ;;  %v2886_v16 = vpop.f32.mrb[7].mxu0  ;;  %v2060_v5 = vshrl.u32 %v2059_v2, 7 }
 0x127   : > { %v1617_v17 = vadd.f32 %v2884_v7, %v1577_v3  ;;  %v2908_v18 = vpop.f32.mrb[7].mxu1 }
 0x128   : > { %v2061_v7 = vsub.s32 0, %v2060_v5 }
 0x129   : > { %v1657_v19 = vadd.f32 %v2906_v14, %v1617_v17 }
 0x143   : > { %v2926_v20 = vpop.f32.mrb[8].mxu0 }
 0x144   : > { %v2948_v21 = vpop.f32.mrb[8].mxu1  ;;  %v2927_v22 = vpop.f32.mrb[9].mxu0 }
 0x145   : > { %v2928_v23 = vadd.f32 %v2927_v22, %v2926_v20  ;;  %v2949_v24 = vpop.f32.mrb[9].mxu1  ;;  %v2929_v25 = vpop.f32.mrb[10].mxu0 }
 0x146   : > { %v2950_v26 = vadd.f32 %v2949_v24, %v2948_v21  ;;  %v2951_v27 = vpop.f32.mrb[10].mxu1  ;;  %v2930_v31 = vpop.f32.mrb[11].mxu0 }
 0x147   : > { %v1697_v32 = vadd.f32 %v2928_v23, %v1657_v19  ;;  %v2952_v33 = vpop.f32.mrb[11].mxu1  ;;  %v2077_v19 = vstv %s2076_s27 }
 0x149   : > { %v1737_v35 = vadd.f32 %v2950_v26, %v1697_v32 }
 0x163   : > { %v2970_v36 = vpop.f32.mrb[12].mxu0 }
 0x164   : > { %v2992_v38 = vpop.f32.mrb[12].mxu1  ;;  %v2971_v39 = vpop.f32.mrb[13].mxu0 }
 0x165   : > { %v2993_v40 = vpop.f32.mrb[13].mxu1  ;;  %v2972_v41 = vadd.f32 %v2971_v39, %v2970_v36  ;;  %v2973_v44 = vpop.f32.mrb[14].mxu0 }
 0x166   : > { %v2994_v42 = vadd.f32 %v2993_v40, %v2992_v38  ;;  %v2995_v45 = vpop.f32.mrb[14].mxu1  ;;  %v2974_v46 = vpop.f32.mrb[15].mxu0 }
 0x167   : > { %v2996_v47 = vpop.f32.mrb[15].mxu1  ;;  %v1777_v49 = vadd.f32 %v2972_v41, %v1737_v35 }
 0x169   : > { %v1817_v55 = vadd.f32 %v2994_v42, %v1777_v49  ;;  %v3225_v42 = vmov 1966171168  }
 0x16a   : > { %v2487_v44 = vunpack.c.l.s4 %v3225_v42 }
 0x16b   : > { %v1822_v58 = vmax.f32 %v1817_v55, 0.0  ;;  %v3211_v55 = vld [vmem:[%s3402_s18 + $0x8] sm:$0xff] }
 0x16c   : > { %v1976_v59 = vpop.f32.mrb[16].mxu1  ;;  %v2488_v45 = vunpack.c.0.s8 %v2487_v44 }
 0x16d   : > { %v3034_v62 = vpop.f32.mrb[17].mxu1  ;;  %3022 = vmatmul.mubr.msk.f32.vlgmr.msra.gmra.mrb[16].mxu0 %vm1827_vm1, %v1822_v58  ;;  %v1977_v63 = vadd.f32 %v1976_v59, %v1906_v57  ;;  %v3212_v57 = vld [vmem:[%s3402_s18 + $0x10] sm:$0xff]  ;;  %v3213_v59 = vld [vmem:[%s3402_s18 + $0x18] sm:$0xff]  ;;  %s2684_s18 = sshll.u32 %s4064_s24, 4 }
 0x16e   : > { %3060 = vmatpush3.bf16.msra.mxu0 %v3059_v56  ;;  %3043 = vmatprep.mubr.msk.f32.mxu0 %vm3223_vm0, %v3224_v43  ;;  %v3834_v49 = vsub.s32 %v2488_v45, %v2060_v5  ;;  %s433_s16 = scalar_lea.vmem %s4042_s11, %s2684_s18 }
 0x16f   : > { %3061 = vmatprep.subr.bf16.mxu0 %v3222_v37  ;;  %v1980_v1 = vmax.f32 %v1977_v63, 0.0  ;;  %v2818_v37 = vld [vmem:[%s4040_s9] ss:$0 sm:$0xff] }
 0x170   : > { %4049 = vst [vmem:[#allocation3_spill] sm:$0xff] %v3834_v49 }
 0x172   : > { %3063 = vmatpush3.bf16.msra.mxu0 %v3062_v0 }
 0x175   : > { %3044 = vmatmul.mubr.msk.f32.vlgmr.msra.gmra.mrb[18].mxu0 %vm1827_vm1, %v1980_v1 }
 0x240   : > { %v1897_v3 = vpop.f32.mrb[16].mxu0 }
 0x241   : > { %v3023_v4 = vpop.f32.mrb[17].mxu0 }
 0x248   : > { %v2055_v10 = vpop.f32.mrb[18].mxu0 }
 0x249   : > { %v2056_v11 = vadd.f32 %v2055_v10, %v1985_v6  ;;  %v3045_v14 = vpop.f32.mrb[19].mxu0 }
 0x24b   : > { %v2062_v15 = vrot.slane %v2056_v11, %v2061_v7 }
 0x24d   : > { %v2063_v43 = vadd.f32 %v2062_v15, %v1897_v3 }
 0x24f   : > { %3204 = vtanh.f32 %v2063_v43 }
 0x259   : > { %v3205_v16 = vpop.eup %3204 }
 0x25a   : > { %v2072_v17 = vmul.f32 %v3205_v16, %v2818_v37 }
 0x25c   : > { %v2073_v18 = vsel %vm1827_vm1, %v2072_v17, 0.0 }
 0x25d   : > { %2074 = vadd.xlane.f32.xlu0 %v2073_v18 }
 0x2ea   : > { %v2075_v20 = vpop.xlane.xlu0 %2074 }
 0x2eb   : > { %v2078_v21 = vadd.f32 %v2077_v19, %v2075_v20 }
 0x2ed   : > { %v2079_v22 = vrot.slane %v2078_v21, 4 }
 0x2ef   : > { %v2080_v23 = vmax.f32 %v2078_v21, %v2079_v22 }
 0x2f1   : > { %v2081_v24 = vrot.slane %v2080_v23, 2 }
 0x2f3   : > { %v2082_v25 = vmax.f32 %v2080_v23, %v2081_v24 }
 0x2f5   : > { %v2083_v26 = vrot.slane %v2082_v25, 1 }
 0x2f7   : > { %v2084_v27 = vmax.f32 %v2082_v25, %v2083_v26 }
 0x2f9   : > { %v2085_v31 = vsub.f32 %v2078_v21, %v2084_v27 }
 0x2fb   : > { %v2086_v32 = vmul.f32 1.442695, %v2085_v31 }
 0x2fd   : > { %3206 = vpow2.f32 %v2086_v32 }
 0x307   : > { %v3207_v33 = vpop.eup %3206 }
 0x308   : > { %v2088_v35 = vrot.slane %v3207_v33, 4 }
 0x30a   : > { %v2089_v36 = vadd.f32 %v3207_v33, %v2088_v35 }
 0x30c   : > { %v2090_v38 = vrot.slane %v2089_v36, 2 }
 0x30e   : > { %v2091_v39 = vadd.f32 %v2090_v38, %v2089_v36 }
 0x310   : > { %v2092_v40 = vrot.slane %v2091_v39, 1 }
 0x312   : > { %v2093_v41 = vadd.f32 %v2092_v40, %v2091_v39 }
 0x314   : > { %3208 = vrcp.f32 %v2093_v41 }
 0x31e   : > { %v3209_v46 = vpop.eup %3208 }
 0x31f   : > { %v2095_v47 = vmul.f32 %v3209_v46, %v3207_v33 }
 0x321   : > { %2097 = vst.msk [vmem:[%s437_s13] sm:$0xff] %vm2096_vm2, %v2095_v47  ;;  %v3837_v54 = vmul.f32 %v3210_v53, %v2095_v47  ;;  %v3840_v56 = vmul.f32 %v3211_v55, %v2095_v47  ;;  %v3843_v58 = vmul.f32 %v3212_v57, %v2095_v47  ;;  %v3846_v60 = vmul.f32 %v3213_v59, %v2095_v47 }
 0x322   : > { %v3849_v61 = vmul.f32 %v2095_v47, %v3521_v12  ;;  %v3852_v62 = vmul.f32 %v2095_v47, %v3511_v8  ;;  %v3855_v63 = vmul.f32 %v2095_v47, %v3524_v13  ;;  %v3858_v0 = vmul.f32 %v2095_v47, %v3514_v9 }
 0x323   : > { %v3861_v1 = vmul.f32 %v2095_v47, %v3635_v51  ;;  %v3864_v2 = vmul.f32 %v2095_v47, %v3627_v48  ;;  %v3867_v3 = vmul.f32 %v2095_v47, %v3638_v52  ;;  %v3870_v12 = vmul.f32 %v2095_v47, %v3632_v50 }
 0x324   : > { %v3873_v8 = vmul.f32 %v2095_v47, %v3749_v30  ;;  %v3876_v13 = vmul.f32 %v2095_v47, %v3743_v28  ;;  %v3879_v9 = vmul.f32 %v2095_v47, %v3758_v34  ;;  %v3882_v51 = vmul.f32 %v2095_v47, %v3746_v29 }
 0x325   : > { %v2130_v48 = vrot.slane %v3837_v54, 1  ;;  %v2131_v52 = vrot.slane %v3840_v56, 1  ;;  %v2132_v4 = vrot.slane %v3843_v58, 1  ;;  %v2133_v50 = vrot.slane %v3846_v60, 1 }
 0x326   : > { %4050 = vst [vmem:[#allocation4_spill] sm:$0xff] %v3879_v9  ;;  %4051 = vst [vmem:[#allocation5_spill] sm:$0xff] %v3882_v51  ;;  %v2134_v30 = vrot.slane %v3849_v61, 1  ;;  %v2135_v5 = vrot.slane %v3852_v62, 1  ;;  %v2136_v28 = vrot.slane %v3855_v63, 1  ;;  %v2137_v34 = vrot.slane %v3858_v0, 1 }
 0x327   : > { %v2138_v6 = vrot.slane %v3861_v1, 1  ;;  %v2139_v29 = vrot.slane %v3864_v2, 1  ;;  %v2140_v7 = vrot.slane %v3867_v3, 1  ;;  %v2141_v10 = vrot.slane %v3870_v12, 1 }
 0x328   : > { %v2142_v11 = vrot.slane %v3873_v8, 1  ;;  %v2143_v14 = vrot.slane %v3876_v13, 1  ;;  %v2144_v15 = vrot.slane %v3879_v9, 1  ;;  %v2145_v43 = vrot.slane %v3882_v51, 1 }
 0x329   : > { %v2162_v37 = vadd.f32 %v2130_v48, %v3837_v54  ;;  %v2163_v16 = vadd.f32 %v2131_v52, %v3840_v56  ;;  %v2164_v17 = vadd.f32 %v2132_v4, %v3843_v58  ;;  %v2165_v18 = vadd.f32 %v2133_v50, %v3846_v60 }
 0x32a   : > { %v2166_v19 = vadd.f32 %v2134_v30, %v3849_v61  ;;  %v2167_v20 = vadd.f32 %v2135_v5, %v3852_v62  ;;  %v2168_v21 = vadd.f32 %v2136_v28, %v3855_v63  ;;  %v2169_v22 = vadd.f32 %v2137_v34, %v3858_v0 }
 0x32b   : > { %v2170_v23 = vadd.f32 %v2138_v6, %v3861_v1  ;;  %v2171_v24 = vadd.f32 %v2139_v29, %v3864_v2  ;;  %v2172_v25 = vadd.f32 %v2140_v7, %v3867_v3  ;;  %v2173_v26 = vadd.f32 %v2141_v10, %v3870_v12 }
 0x32c   : > { %v2174_v27 = vadd.f32 %v2142_v11, %v3873_v8  ;;  %v2175_v31 = vadd.f32 %v2143_v14, %v3876_v13  ;;  %v2176_v32 = vadd.f32 %v2144_v15, %v3879_v9  ;;  %v2177_v33 = vadd.f32 %v2145_v43, %v3882_v51 }
 0x32d   : > { %v2178_v35 = vrot.slane %v3837_v54, 2  ;;  %v2179_v36 = vrot.slane %v3840_v56, 2  ;;  %v2180_v38 = vrot.slane %v3843_v58, 2  ;;  %v2181_v39 = vrot.slane %v3846_v60, 2 }
 0x32e   : > { %v2182_v40 = vrot.slane %v3849_v61, 2  ;;  %v2183_v41 = vrot.slane %v3852_v62, 2  ;;  %v2184_v42 = vrot.slane %v3855_v63, 2  ;;  %v2185_v44 = vrot.slane %v3858_v0, 2 }
 0x32f   : > { %v2186_v45 = vrot.slane %v3861_v1, 2  ;;  %v2187_v46 = vrot.slane %v3864_v2, 2  ;;  %v2188_v47 = vrot.slane %v3867_v3, 2  ;;  %v2189_v53 = vrot.slane %v3870_v12, 2 }
 0x330   : > { %v2190_v55 = vrot.slane %v3873_v8, 2  ;;  %v2191_v57 = vrot.slane %v3876_v13, 2  ;;  %v2192_v59 = vrot.slane %v3879_v9, 2  ;;  %v2193_v48 = vrot.slane %v3882_v51, 2 }
 0x331   : > { %v2210_v52 = vadd.f32 %v2178_v35, %v2162_v37  ;;  %v2211_v4 = vadd.f32 %v2179_v36, %v2163_v16  ;;  %v2212_v50 = vadd.f32 %v2180_v38, %v2164_v17  ;;  %v2213_v30 = vadd.f32 %v2181_v39, %v2165_v18 }
 0x332   : > { %v2214_v5 = vadd.f32 %v2182_v40, %v2166_v19  ;;  %v2215_v28 = vadd.f32 %v2183_v41, %v2167_v20  ;;  %v2216_v34 = vadd.f32 %v2184_v42, %v2168_v21  ;;  %v2217_v6 = vadd.f32 %v2185_v44, %v2169_v22 }
 0x333   : > { %v2218_v29 = vadd.f32 %v2186_v45, %v2170_v23  ;;  %v2219_v7 = vadd.f32 %v2187_v46, %v2171_v24  ;;  %v2220_v10 = vadd.f32 %v2188_v47, %v2172_v25  ;;  %v2221_v11 = vadd.f32 %v2189_v53, %v2173_v26 }
 0x334   : > { %v2222_v14 = vadd.f32 %v2190_v55, %v2174_v27  ;;  %v2223_v15 = vadd.f32 %v2191_v57, %v2175_v31  ;;  %v2224_v43 = vadd.f32 %v2192_v59, %v2176_v32  ;;  %v2225_v49 = vadd.f32 %v2193_v48, %v2177_v33  ;;  %v4052_v27 = vld [vmem:[#allocation4_spill] sm:$0xff]  ;;  %v4053_v32 = vld [vmem:[#allocation5_spill] sm:$0xff] }
 0x335   : > { %v2226_v9 = vrot.slane %v3837_v54, 3  ;;  %v2227_v51 = vrot.slane %v3840_v56, 3  ;;  %v2228_v37 = vrot.slane %v3843_v58, 3  ;;  %v2229_v16 = vrot.slane %v3846_v60, 3 }
 0x336   : > { %v2230_v17 = vrot.slane %v3849_v61, 3  ;;  %v2231_v18 = vrot.slane %v3852_v62, 3  ;;  %v2232_v19 = vrot.slane %v3855_v63, 3  ;;  %v2233_v20 = vrot.slane %v3858_v0, 3 }
 0x337   : > { %v2234_v21 = vrot.slane %v3861_v1, 3  ;;  %v2235_v22 = vrot.slane %v3864_v2, 3  ;;  %v2236_v23 = vrot.slane %v3867_v3, 3  ;;  %v2237_v24 = vrot.slane %v3870_v12, 3 }
 0x338   : > { %v2238_v25 = vrot.slane %v3873_v8, 3  ;;  %v2239_v26 = vrot.slane %v3876_v13, 3  ;;  %v2240_v31 = vrot.slane %v4052_v27, 3  ;;  %v2241_v33 = vrot.slane %v4053_v32, 3 }
 0x339   : > { %v2258_v35 = vadd.f32 %v2226_v9, %v2210_v52  ;;  %v2259_v36 = vadd.f32 %v2227_v51, %v2211_v4  ;;  %v2260_v38 = vadd.f32 %v2228_v37, %v2212_v50  ;;  %v2261_v39 = vadd.f32 %v2229_v16, %v2213_v30 }
 0x33a   : > { %v2262_v40 = vadd.f32 %v2230_v17, %v2214_v5  ;;  %v2263_v41 = vadd.f32 %v2231_v18, %v2215_v28  ;;  %v2264_v42 = vadd.f32 %v2232_v19, %v2216_v34  ;;  %v2265_v44 = vadd.f32 %v2233_v20, %v2217_v6 }
 0x33b   : > { %v2266_v45 = vadd.f32 %v2234_v21, %v2218_v29  ;;  %v2267_v46 = vadd.f32 %v2235_v22, %v2219_v7  ;;  %v2268_v47 = vadd.f32 %v2236_v23, %v2220_v10  ;;  %v2269_v53 = vadd.f32 %v2237_v24, %v2221_v11  ;;  %v4054_v7 = vld [vmem:[#allocation4_spill] sm:$0xff]  ;;  %v4055_v11 = vld [vmem:[#allocation5_spill] sm:$0xff] }
 0x33c   : > { %v2270_v55 = vadd.f32 %v2238_v25, %v2222_v14  ;;  %v2271_v57 = vadd.f32 %v2239_v26, %v2223_v15  ;;  %v2272_v59 = vadd.f32 %v2240_v31, %v2224_v43  ;;  %v2273_v48 = vadd.f32 %v2241_v33, %v2225_v49 }
 0x33d   : > { %v2274_v27 = vrot.slane %v3837_v54, 4  ;;  %v2275_v32 = vrot.slane %v3840_v56, 4  ;;  %v2276_v9 = vrot.slane %v3843_v58, 4  ;;  %v2277_v51 = vrot.slane %v3846_v60, 4 }
 0x33e   : > { %v2278_v52 = vrot.slane %v3849_v61, 4  ;;  %v2279_v4 = vrot.slane %v3852_v62, 4  ;;  %v2280_v50 = vrot.slane %v3855_v63, 4  ;;  %v2281_v30 = vrot.slane %v3858_v0, 4 }
 0x33f   : > { %v2282_v5 = vrot.slane %v3861_v1, 4  ;;  %v2283_v49 = vrot.slane %v3864_v2, 4  ;;  %v2284_v28 = vrot.slane %v3867_v3, 4  ;;  %v2285_v34 = vrot.slane %v3870_v12, 4 }
 0x340   : > { %v2286_v6 = vrot.slane %v3873_v8, 4  ;;  %v2287_v29 = vrot.slane %v3876_v13, 4  ;;  %v2288_v10 = vrot.slane %v4054_v7, 4  ;;  %v2289_v14 = vrot.slane %v4055_v11, 4 }
 0x341   : > { %v2306_v15 = vadd.f32 %v2274_v27, %v2258_v35  ;;  %v2307_v43 = vadd.f32 %v2275_v32, %v2259_v36  ;;  %v2308_v37 = vadd.f32 %v2276_v9, %v2260_v38  ;;  %v2309_v16 = vadd.f32 %v2277_v51, %v2261_v39 }
 0x342   : > { %v2310_v17 = vadd.f32 %v2278_v52, %v2262_v40  ;;  %v2311_v18 = vadd.f32 %v2279_v4, %v2263_v41  ;;  %v2312_v19 = vadd.f32 %v2280_v50, %v2264_v42  ;;  %v2313_v20 = vadd.f32 %v2281_v30, %v2265_v44 }
 0x343   : > { %v2314_v21 = vadd.f32 %v2282_v5, %v2266_v45  ;;  %v2315_v22 = vadd.f32 %v2283_v49, %v2267_v46  ;;  %v2316_v23 = vadd.f32 %v2284_v28, %v2268_v47  ;;  %v2317_v24 = vadd.f32 %v2285_v34, %v2269_v53  ;;  %v4056_v47 = vld [vmem:[#allocation4_spill] sm:$0xff] }
 0x344   : > { %v2318_v25 = vadd.f32 %v2286_v6, %v2270_v55  ;;  %v2319_v26 = vadd.f32 %v2287_v29, %v2271_v57  ;;  %v2320_v31 = vadd.f32 %v2288_v10, %v2272_v59  ;;  %v2321_v33 = vadd.f32 %v2289_v14, %v2273_v48  ;;  %v4057_v55 = vld [vmem:[#allocation5_spill] sm:$0xff] }
 0x345   : > { %v2322_v7 = vrot.slane %v3837_v54, 5  ;;  %v2323_v11 = vrot.slane %v3840_v56, 5  ;;  %v2324_v27 = vrot.slane %v3843_v58, 5  ;;  %v2325_v32 = vrot.slane %v3846_v60, 5 }
 0x346   : > { %v2326_v35 = vrot.slane %v3849_v61, 5  ;;  %v2327_v36 = vrot.slane %v3852_v62, 5  ;;  %v2328_v38 = vrot.slane %v3855_v63, 5  ;;  %v2329_v39 = vrot.slane %v3858_v0, 5 }
 0x347   : > { %v2330_v40 = vrot.slane %v3861_v1, 5  ;;  %v2331_v41 = vrot.slane %v3864_v2, 5  ;;  %v2332_v42 = vrot.slane %v3867_v3, 5  ;;  %v2333_v44 = vrot.slane %v3870_v12, 5 }
 0x348   : > { %v2334_v45 = vrot.slane %v3873_v8, 5  ;;  %v2335_v46 = vrot.slane %v3876_v13, 5  ;;  %v2336_v53 = vrot.slane %v4056_v47, 5  ;;  %v2337_v57 = vrot.slane %v4057_v55, 5 }
 0x349   : > { %v2354_v59 = vadd.f32 %v2322_v7, %v2306_v15  ;;  %v2355_v48 = vadd.f32 %v2323_v11, %v2307_v43  ;;  %v2356_v9 = vadd.f32 %v2324_v27, %v2308_v37  ;;  %v2357_v51 = vadd.f32 %v2325_v32, %v2309_v16 }
 0x34a   : > { %v2358_v52 = vadd.f32 %v2326_v35, %v2310_v17  ;;  %v2359_v4 = vadd.f32 %v2327_v36, %v2311_v18  ;;  %v2360_v50 = vadd.f32 %v2328_v38, %v2312_v19  ;;  %v2361_v30 = vadd.f32 %v2329_v39, %v2313_v20 }
 0x34b   : > { %v2362_v5 = vadd.f32 %v2330_v40, %v2314_v21  ;;  %v2363_v49 = vadd.f32 %v2331_v41, %v2315_v22  ;;  %v2364_v28 = vadd.f32 %v2332_v42, %v2316_v23  ;;  %v2365_v34 = vadd.f32 %v2333_v44, %v2317_v24  ;;  %v4058_v23 = vld [vmem:[#allocation4_spill] sm:$0xff] }
 0x34c   : > { %v2366_v6 = vadd.f32 %v2334_v45, %v2318_v25  ;;  %v2367_v29 = vadd.f32 %v2335_v46, %v2319_v26  ;;  %v2368_v10 = vadd.f32 %v2336_v53, %v2320_v31  ;;  %v2369_v14 = vadd.f32 %v2337_v57, %v2321_v33  ;;  %v4059_v25 = vld [vmem:[#allocation5_spill] sm:$0xff] }
 0x34d   : > { %v2370_v47 = vrot.slane %v3837_v54, 6  ;;  %v2371_v55 = vrot.slane %v3840_v56, 6  ;;  %v2372_v7 = vrot.slane %v3843_v58, 6  ;;  %v2373_v11 = vrot.slane %v3846_v60, 6 }
 0x34e   : > { %v2374_v15 = vrot.slane %v3849_v61, 6  ;;  %v2375_v43 = vrot.slane %v3852_v62, 6  ;;  %v2376_v37 = vrot.slane %v3855_v63, 6  ;;  %v2377_v16 = vrot.slane %v3858_v0, 6 }
 0x34f   : > { %v2378_v17 = vrot.slane %v3861_v1, 6  ;;  %v2379_v18 = vrot.slane %v3864_v2, 6  ;;  %v2380_v19 = vrot.slane %v3867_v3, 6  ;;  %v2381_v20 = vrot.slane %v3870_v12, 6 }
 0x350   : > { %v2382_v21 = vrot.slane %v3873_v8, 6  ;;  %v2383_v22 = vrot.slane %v3876_v13, 6  ;;  %v2384_v24 = vrot.slane %v4058_v23, 6  ;;  %v2385_v26 = vrot.slane %v4059_v25, 6 }
 0x351   : > { %v2402_v31 = vadd.f32 %v2370_v47, %v2354_v59  ;;  %v2403_v33 = vadd.f32 %v2371_v55, %v2355_v48  ;;  %v2404_v27 = vadd.f32 %v2372_v7, %v2356_v9  ;;  %v2405_v32 = vadd.f32 %v2373_v11, %v2357_v51 }
 0x352   : > { %v2406_v35 = vadd.f32 %v2374_v15, %v2358_v52  ;;  %v2407_v36 = vadd.f32 %v2375_v43, %v2359_v4  ;;  %v2408_v38 = vadd.f32 %v2376_v37, %v2360_v50  ;;  %v2409_v39 = vadd.f32 %v2377_v16, %v2361_v30  ;;  %v4060_v50 = vld [vmem:[#allocation4_spill] sm:$0xff]  ;;  %v4061_v30 = vld [vmem:[#allocation5_spill] sm:$0xff] }
 0x353   : > { %v2410_v40 = vadd.f32 %v2378_v17, %v2362_v5  ;;  %v2411_v41 = vadd.f32 %v2379_v18, %v2363_v49  ;;  %v2412_v42 = vadd.f32 %v2380_v19, %v2364_v28  ;;  %v2413_v44 = vadd.f32 %v2381_v20, %v2365_v34  ;;  %v4062_v19 = vld [vmem:[#allocation3_spill] sm:$0xff] }
 0x354   : > { %v2414_v45 = vadd.f32 %v2382_v21, %v2366_v6  ;;  %v2415_v46 = vadd.f32 %v2383_v22, %v2367_v29  ;;  %v2416_v53 = vadd.f32 %v2384_v24, %v2368_v10  ;;  %v2417_v57 = vadd.f32 %v2385_v26, %v2369_v14 }
 0x355   : > { %v2418_v23 = vrot.slane %v3837_v54, 7  ;;  %v2419_v25 = vrot.slane %v3840_v56, 7  ;;  %v2420_v47 = vrot.slane %v3843_v58, 7  ;;  %v2421_v55 = vrot.slane %v3846_v60, 7 }
 0x356   : > { %v2422_v59 = vrot.slane %v3849_v61, 7  ;;  %v2423_v48 = vrot.slane %v3852_v62, 7  ;;  %v2424_v9 = vrot.slane %v3855_v63, 7  ;;  %v2425_v51 = vrot.slane %v3858_v0, 7 }
 0x357   : > { %v2426_v52 = vrot.slane %v3861_v1, 7  ;;  %v2427_v4 = vrot.slane %v3864_v2, 7  ;;  %v2428_v54 = vrot.slane %v3867_v3, 7  ;;  %v2429_v56 = vrot.slane %v3870_v12, 7 }
 0x358   : > { %v2430_v58 = vrot.slane %v3873_v8, 7  ;;  %v2431_v60 = vrot.slane %v3876_v13, 7  ;;  %v2432_v61 = vrot.slane %v4060_v50, 7  ;;  %v2433_v62 = vrot.slane %v4061_v30, 7 }
 0x359   : > { %v2450_v5 = vadd.f32 %v2418_v23, %v2402_v31  ;;  %v2451_v63 = vadd.f32 %v2419_v25, %v2403_v33  ;;  %v2452_v49 = vadd.f32 %v2420_v47, %v2404_v27  ;;  %v2453_v0 = vadd.f32 %v2421_v55, %v2405_v32 }
 0x35a   : > { %v2454_v28 = vadd.f32 %v2422_v59, %v2406_v35  ;;  %v2455_v1 = vadd.f32 %v2423_v48, %v2407_v36  ;;  %v2456_v34 = vadd.f32 %v2424_v9, %v2408_v38  ;;  %v2457_v2 = vadd.f32 %v2425_v51, %v2409_v39 }
 0x35b   : > { %v2458_v6 = vadd.f32 %v2426_v52, %v2410_v40  ;;  %v2459_v3 = vadd.f32 %v2427_v4, %v2411_v41  ;;  %v2460_v29 = vadd.f32 %v2428_v54, %v2412_v42  ;;  %v2461_v12 = vadd.f32 %v2429_v56, %v2413_v44 }
 0x35c   : > { %v2462_v10 = vadd.f32 %v2430_v58, %v2414_v45  ;;  %v2463_v8 = vadd.f32 %v2431_v60, %v2415_v46  ;;  %v2464_v14 = vadd.f32 %v2432_v61, %v2416_v53  ;;  %v2465_v13 = vadd.f32 %v2433_v62, %v2417_v57 }
 0x35d   : > { %v2482_v7 = vcombine.low %v2450_v5, %v2451_v63  ;;  %v2483_v11 = vcombine.low %v2452_v49, %v2453_v0  ;;  %v2484_v15 = vcombine.low %v2454_v28, %v2455_v1  ;;  %v2485_v43 = vcombine.low %v2456_v34, %v2457_v2 }
 0x35e   : > { %v2531_v37 = vcombine.low %v2458_v6, %v2459_v3  ;;  %v2532_v16 = vcombine.low %v2460_v29, %v2461_v12  ;;  %v2533_v17 = vcombine.low %v2462_v10, %v2463_v8  ;;  %v2534_v18 = vcombine.low %v2464_v14, %v2465_v13 }
 0x35f   : > { %v2492_v20 = vrot.slane %v2482_v7, %v4062_v19  ;;  %v2499_v21 = vrot.slane %v2483_v11, %v4062_v19  ;;  %v2506_v22 = vrot.slane %v2484_v15, %v4062_v19  ;;  %v2513_v23 = vrot.slane %v2485_v43, %v4062_v19 }
 0x360   : > { %v2541_v24 = vrot.slane %v2531_v37, %v4062_v19  ;;  %v2548_v25 = vrot.slane %v2532_v16, %v4062_v19  ;;  %v2555_v26 = vrot.slane %v2533_v17, %v4062_v19  ;;  %v2562_v31 = vrot.slane %v2534_v18, %v4062_v19 }
 0x361   : > { %v2514_v33 = vcombine.low %v2492_v20, %v2499_v21  ;;  %v2515_v27 = vcombine.low %v2506_v22, %v2513_v23 }
 0x362   : > { %v2563_v32 = vcombine.low %v2541_v24, %v2548_v25  ;;  %v2564_v35 = vcombine.low %v2555_v26, %v2562_v31 }
 0x363   : > { %v2522_v36 = vrot.slane %v2514_v33, %v4062_v19  ;;  %v2529_v38 = vrot.slane %v2515_v27, %v4062_v19 }
 0x364   : > { %v2571_v39 = vrot.slane %v2563_v32, %v4062_v19  ;;  %v2578_v40 = vrot.slane %v2564_v35, %v4062_v19 }
 0x365   : > { %v2530_v41 = vcombine.low %v2522_v36, %v2529_v38 }
 0x366   : > { %v2579_v42 = vcombine.low %v2571_v39, %v2578_v40 }
 0x367   : > { %2582 = vst [vmem:[%s433_s16] sm:$0xff] %v2530_v41 }
 0x368   : > { %2583 = vst [vmem:[%s433_s16 + $0x8] sm:$0xff] %v2579_v42 }
 0x369 PF: > { %s24_s23 = sadd.s32 1, %s3220_s23  }
 0x36a   : > { %p21_p4 = scmp.ge.s32.totalorder %s24_s23, 4  }
 0x36c   :  { %23 = sbr.rel (!%p21_p4) target bundleno = 2 (0x2), region = 109 }

</bundles_post_ra>
